<compile_context>
chip_gen: v6e
topology: v6e:2x2x1
jax: 0.10.0
libtpu: 0.0.40
codegen_flags: <defaults>
</compile_context>

<pallas_src>
import functools

import numpy as np
import jax
import jax.numpy as jnp
from jax.experimental import pallas as pl
from jax.experimental.pallas import tpu as pltpu

EPS = 1e-8  # F.cosine_similarity eps; applied to ||x|| (text features pre-normalized)


# --------------------------------------------------------------------------
# Fused kernel: per-layer cosine maps (pipelined over L) + softmax fuse +
# global min-max + CLS score + bicubic upsample (tail on the last grid step).
# --------------------------------------------------------------------------
def _make_kernel(L, B, T, H, W):
    P = H * W

    def kernel(feat_ref, txt_ref, wy_ref, wxt_ref,
               score_ref, amap_ref, patch_ref,
               diffs_sc, cls_sc):
        l = pl.program_id(0)

        # token mask from a 2-D iota (no offset slices on the big tensors)
        tok = jax.lax.broadcasted_iota(jnp.int32, (B, T), 1)
        patch_mask = (tok >= 1).astype(jnp.float32)          # 0 at CLS, 1 at patch tokens

        @pl.when(l == 0)
        def _init():
            cls_sc[...] = jnp.zeros_like(cls_sc)

        # ---------------- per-layer work (one layer per grid step) ----------------
        x32 = feat_ref[...].astype(jnp.float32)              # [B, T, D]
        txt = txt_ref[...].astype(jnp.float32)                # [B, 2, D], unit-norm rows

        # raw image-text dots on the MXU, lane-dense result [B, 2, T]
        dots = jnp.einsum('bkd,btd->bkt', txt, x32,
                          preferred_element_type=jnp.float32)

        # image-feature norms; divide only AFTER the k-reduction (dense [B,T] shapes)
        x_norm = jnp.sqrt(jnp.sum(x32 * x32, axis=-1))        # [B, T]
        inv_n = 1.0 / jnp.maximum(x_norm, EPS)                 # exact reciprocal (tiny)

        # (abnormal - normal) cosine per token, CLS slot zeroed; stash in scratch
        diff = (dots[:, 1, :] - dots[:, 0, :]) * inv_n * patch_mask      # [B, T]
        diffs_sc[l] = diff

        # CLS (global) cosine sims: static token-0 slice of the dots
        cls_cos = dots[:, :, 0] / jnp.maximum(x_norm[:, 0:1], EPS)       # [B, 2]
        cls_sc[...] = cls_sc[...] + cls_cos

        # ---------------- tail: softmax fuse, min-max, bicubic --------------------
        @pl.when(l == L - 1)
        def _tail():
            score_ref[...] = cls_sc[...] * (1.0 / L)           # [B, 2]

            diffs = diffs_sc[...]                              # [L, B, T]
            # per-layer spatial means (CLS already zeroed) -> softmax over layers
            means = jnp.sum(diffs, axis=-1, keepdims=True) * (1.0 / P)   # [L, B, 1]
            m = jnp.max(means, axis=0, keepdims=True)
            e = jnp.exp(means - m)
            w = e / jnp.sum(e, axis=0, keepdims=True)          # exact normalizer [L, B, 1]
            amp = jnp.sum(diffs * w, axis=0)                   # [B, T]

            # global (whole-batch) min-max over the patch tokens only
            valid = patch_mask > 0.5
            mp_max = jnp.max(jnp.where(valid, amp, -3e38))
            mp_min = jnp.min(jnp.where(valid, amp, 3e38))
            d = mp_max - mp_min
            scale = jnp.where(d > 1e-6, 1.0 / jnp.maximum(d, 1e-30), 0.0)
            amp_n = (amp - mp_min) * scale                     # [B, T]

            # lay out patch tokens as [B, H, W]: direct row stores into the output
            # ref (no stack / minor-dim reshape), then read the VMEM buffer back.
            for i in range(H):
                patch_ref[:, i, :] = amp_n[:, 1 + i * W: 1 + (i + 1) * W]
            patch = patch_ref[...]                             # [B, H, W]

            # bicubic upsample: separable + batched, lane-dense intermediates
            #   tmp[b]  = patch[b] @ WxT   ->  [H, O]
            #   amap[b] = Wy @ tmp[b]      ->  [O, O]
            tmp = jnp.einsum('bhw,bwq->bhq', patch, wxt_ref[...],
                             preferred_element_type=jnp.float32)         # [B, H, O]
            amap = jnp.einsum('boh,bhq->boq', wy_ref[...], tmp,
                              preferred_element_type=jnp.float32)        # [B, O, O]
            amap_ref[...] = amap

    return kernel


# --------------------------------------------------------------------------
# Bicubic weights: exact replica of PyTorch upsample_bicubic2d (align_corners=False).
# --------------------------------------------------------------------------
@functools.lru_cache(maxsize=None)
def _bicubic_matrix(in_size, out_size, A=-0.75):
    scale = in_size / out_size
    j = np.arange(out_size, dtype=np.float64)
    x = (j + 0.5) * scale - 0.5
    xf = np.floor(x)
    t = x - xf

    def cc1(v):  # |t| <= 1
        return ((A + 2.0) * v - (A + 3.0)) * v * v + 1.0

    def cc2(v):  # 1 < |t| < 2
        return ((A * v - 5.0 * A) * v + 8.0 * A) * v - 4.0 * A

    coeffs = np.stack([cc2(t + 1.0), cc1(t), cc1(1.0 - t), cc2(2.0 - t)], axis=1)
    idx = xf[:, None].astype(np.int64) + np.arange(-1, 3)[None, :]
    idx = np.clip(idx, 0, in_size - 1)
    Wm = np.zeros((out_size, in_size), dtype=np.float32)
    for o in range(out_size):
        for k in range(4):
            Wm[o, idx[o, k]] += coeffs[o, k]
    return Wm


# --------------------------------------------------------------------------
# Forward wrapper (matches AnomalyModule.forward), jitted end-to-end.
# --------------------------------------------------------------------------
@functools.partial(jax.jit, static_argnames=("out_size",))
def anomaly_forward(image_features, text_features, out_size=224):
    """
    Args:
        image_features: list of L arrays [B, T, D]  (T = 1 + H*W; bf16 or f32)
        text_features:  [B, 2, D]  (index 0 = normal prompt, 1 = abnormal prompt)
    Returns:
        anomaly_score     [B, 2]
        anomaly_map       [B, out_size, out_size]
        anomaly_map_patch [B, H, W]
    """
    L = len(image_features)
    B, T, D = image_features[0].shape
    H = W = int(round((T - 1) ** 0.5))
    O = out_size

    # one [L, B, T, D] HBM array -> pipelined layer axis in the kernel
    feats = jnp.stack(image_features, axis=0)

    # pre-normalize text features (removes ||t|| from the kernel; kept in f32)
    t32 = text_features.astype(jnp.float32)
    t_hat = t32 / jnp.maximum(
        jnp.sqrt(jnp.sum(t32 * t32, axis=-1, keepdims=True)), 1e-12)     # [B, 2, D]

    # host-cached bicubic weights, pre-broadcast over B for batched MXU matmuls
    wy = jnp.asarray(_bicubic_matrix(H, out_size))                       # [O, H]
    wxt = jnp.asarray(np.ascontiguousarray(_bicubic_matrix(W, out_size).T))  # [W, O]
    wy_b = jnp.broadcast_to(wy[None], (B, O, H))
    wxt_b = jnp.broadcast_to(wxt[None], (B, W, O))

    kernel = _make_kernel(L, B, T, H, W)

    # explicit VMEM budget (double-buffered layer block + resident outputs + scratch)
    est = (2 * B * T * D * feats.dtype.itemsize      # layer block, double buffered
           + B * 2 * D * 4                           # text
           + 2 * 2 * B * O * max(H, W) * 4           # bicubic weights, double buffered
           + B * O * O * 4 + B * H * W * 4 + B * 2 * 4   # outputs
           + L * B * T * 4 + B * 2 * 4)              # scratch
    vmem_limit = int(min(max(8 * est, 16 * 1024 * 1024), 64 * 1024 * 1024))

    score, amap, patch = pl.pallas_call(
        kernel,
        grid=(L,),
        in_specs=[
            pl.BlockSpec((None, B, T, D), lambda l: (l, 0, 0, 0)),   # one layer / step
            pl.BlockSpec((B, 2, D), lambda l: (0, 0, 0)),
            pl.BlockSpec((B, O, H), lambda l: (0, 0, 0)),
            pl.BlockSpec((B, W, O), lambda l: (0, 0, 0)),
        ],
        out_specs=(
            pl.BlockSpec((B, 2), lambda l: (0, 0)),
            pl.BlockSpec((B, O, O), lambda l: (0, 0, 0)),
            pl.BlockSpec((B, H, W), lambda l: (0, 0, 0)),
        ),
        out_shape=(
            jax.ShapeDtypeStruct((B, 2), jnp.float32),
            jax.ShapeDtypeStruct((B, O, O), jnp.float32),
            jax.ShapeDtypeStruct((B, H, W), jnp.float32),
        ),
        scratch_shapes=[
            pltpu.VMEM((L, B, T), jnp.float32),   # per-layer (abnormal - normal) maps
            pltpu.VMEM((B, 2), jnp.float32),      # CLS cosine accumulator
        ],
        compiler_params=pltpu.CompilerParams(
            dimension_semantics=("arbitrary",),   # L is a reduction (accumulator) axis
            vmem_limit_bytes=vmem_limit,
        ),
    )(feats, t_hat, wy_b, wxt_b)

    return score, amap, patch


# --------------------------------------------------------------------------
# Pure-JAX reference (mirrors the PyTorch module, all f32) for validation.
# --------------------------------------------------------------------------
def _reference(image_features, text_features, out_size=224):
    t32 = text_features.astype(jnp.float32)
    Bn, Tn, _ = image_features[0].shape
    Hh = Ww = int(round((Tn - 1) ** 0.5))

    def cos(a, b):
        num = jnp.sum(a * b, axis=-1)
        den = jnp.maximum(jnp.linalg.norm(a, axis=-1) * jnp.linalg.norm(b, axis=-1), 1e-8)
        return num / den

    maps, scores = [], []
    for x in image_features:
        x32 = x.astype(jnp.float32)
        pf, gf = x32[:, 1:, :], x32[:, 0, :]
        ns = cos(pf, t32[:, None, 0, :])
        ab = cos(pf, t32[:, None, 1, :])
        maps.append((ab - ns).reshape(Bn, Hh, Ww))
        scores.append(jnp.stack([cos(gf, t32[:, 0, :]), cos(gf, t32[:, 1, :])], axis=1))
    lm = jnp.stack(maps, axis=1)                                       # [B, L, H, W]
    wgt = jax.nn.softmax(jnp.mean(lm, axis=(2, 3)), axis=1)
    amp = jnp.sum(lm * wgt[:, :, None, None], axis=1)
    scr = jnp.mean(jnp.stack(scores, axis=1), axis=1)
    mn, mx = jnp.min(amp), jnp.max(amp)
    amp_n = jnp.where(mx - mn > 1e-6, (amp - mn) / (mx - mn), jnp.zeros_like(amp))
    wyr = jnp.asarray(_bicubic_matrix(Hh, out_size))
    wxr = jnp.asarray(_bicubic_matrix(Ww, out_size))
    amapr = jnp.einsum('oh,bhw,qw->boq', wyr, amp_n, wxr)
    return scr, amapr, amp_n


if __name__ == "__main__":
    L, B, T, D = 12, 2, 50, 512   # H = W = 7
    key = jax.random.PRNGKey(0)
    keys = jax.random.split(key, L + 1)
    # CLIP features stay bf16 in HBM; the kernel upcasts internally (f32 also works).
    image_features = [
        jax.random.normal(keys[i], (B, T, D), dtype=jnp.float32).astype(jnp.bfloat16)
        for i in range(L)
    ]
    text_features = jax.random.normal(keys[L], (B, 2, D), dtype=jnp.float32).astype(jnp.bfloat16)

    score, anomaly_map, anomaly_map_patch = anomaly_forward(image_features, text_features)
    jax.block_until_ready((score, anomaly_map, anomaly_map_patch))

    ref_score, ref_map, ref_patch = _reference(image_features, text_features)

    assert score.shape == (B, 2)
    assert anomaly_map.shape == (B, 224, 224)
    assert anomaly_map_patch.shape == (B, 7, 7)
    assert bool(jnp.all(jnp.isfinite(score)))
    assert bool(jnp.all(jnp.isfinite(anomaly_map)))
    assert float(jnp.min(anomaly_map_patch)) >= -1e-5
    assert float(jnp.max(anomaly_map_patch)) <= 1.0 + 1e-5
    assert float(jnp.max(jnp.abs(score - ref_score))) < 2e-3
    assert float(jnp.max(jnp.abs(anomaly_map_patch - ref_patch))) < 1e-2
    assert float(jnp.max(jnp.abs(anomaly_map - ref_map))) < 1e-2
    print("KERNEL_OK")
</pallas_src>

<mosaic_0001>
module attributes {stable_mosaic.version = 11 : i64} {
  func.func @kernel(%arg0: i32, %arg1: memref<1x2x50x512xbf16, #tpu.memory_space<vmem>>, %arg2: memref<2x2x512xf32, #tpu.memory_space<vmem>>, %arg3: memref<2x224x7xf32, #tpu.memory_space<vmem>>, %arg4: memref<2x7x224xf32, #tpu.memory_space<vmem>>, %arg5: memref<2x2xf32, #tpu.memory_space<vmem>>, %arg6: memref<2x224x224xf32, #tpu.memory_space<vmem>>, %arg7: memref<2x7x7xf32, #tpu.memory_space<vmem>>, %arg8: memref<12x2x50xf32, #tpu.memory_space<vmem>>, %arg9: memref<2x2xf32, #tpu.memory_space<vmem>>) attributes {dimension_semantics = [#tpu.dimension_semantics<arbitrary>], iteration_bounds = array<i64: 12>, scalar_prefetch = 0 : i64, scratch_operands = 2 : i64, tpu.core_type = #tpu.core_type<tc>, window_params = [{transform_indices = @transform_0, window_bounds = array<i64: 1, 2, 50, 512>}, {pipeline_mode = #tpu.pipeline_mode<synchronous>, transform_indices = @transform_1, window_bounds = array<i64: 2, 2, 512>}, {pipeline_mode = #tpu.pipeline_mode<synchronous>, transform_indices = @transform_2, window_bounds = array<i64: 2, 224, 7>}, {pipeline_mode = #tpu.pipeline_mode<synchronous>, transform_indices = @transform_3, window_bounds = array<i64: 2, 7, 224>}, {pipeline_mode = #tpu.pipeline_mode<synchronous>, transform_indices = @transform_4, window_bounds = array<i64: 2, 2>}, {pipeline_mode = #tpu.pipeline_mode<synchronous>, transform_indices = @transform_5, window_bounds = array<i64: 2, 224, 224>}, {pipeline_mode = #tpu.pipeline_mode<synchronous>, transform_indices = @transform_6, window_bounds = array<i64: 2, 7, 7>}]} {
    %0 = tpu.iota {dimensions = array<i32: 1>} : vector<2x50xi32>
    %c1_i32 = arith.constant 1 : i32
    %1 = vector.broadcast %c1_i32 : i32 to vector<2x50xi32>
    %2 = arith.cmpi sge, %0, %1 : vector<2x50xi32>
    %3 = arith.extui %2 : vector<2x50xi1> to vector<2x50xi32>
    %4 = arith.sitofp %3 : vector<2x50xi32> to vector<2x50xf32>
    %c0_i32 = arith.constant 0 : i32
    %5 = arith.cmpi eq, %arg0, %c0_i32 : i32
    %6 = arith.extui %5 : i1 to i32
    %c0_i32_0 = arith.constant 0 : i32
    %7 = arith.cmpi ne, %6, %c0_i32_0 : i32
    scf.if %7 {
      %cst_18 = arith.constant 0.000000e+00 : f32
      %44 = vector.broadcast %cst_18 : f32 to vector<2x2xf32>
      %c0_19 = arith.constant 0 : index
      %c0_20 = arith.constant 0 : index
      %45 = vector.load %arg9[%c0_19, %c0_20] : memref<2x2xf32, #tpu.memory_space<vmem>>, vector<2x2xf32>
      tpu.vector_store %arg9[%c0_19, %c0_20], %44 {strides = array<i32>} : memref<2x2xf32, #tpu.memory_space<vmem>>, vector<2x2xf32>,
    } else {
    }
    %c0 = arith.constant 0 : index
    %c0_1 = arith.constant 0 : index
    %c0_2 = arith.constant 0 : index
    %c0_3 = arith.constant 0 : index
    %8 = vector.load %arg1[%c0, %c0_1, %c0_2, %c0_3] : memref<1x2x50x512xbf16, #tpu.memory_space<vmem>>, vector<1x2x50x512xbf16>
    %9 = vector.shape_cast %8 : vector<1x2x50x512xbf16> to vector<2x50x512xbf16>
    %10 = arith.extf %9 : vector<2x50x512xbf16> to vector<2x50x512xf32>
    %c0_4 = arith.constant 0 : index
    %c0_5 = arith.constant 0 : index
    %c0_6 = arith.constant 0 : index
    %11 = vector.load %arg2[%c0_4, %c0_5, %c0_6] : memref<2x2x512xf32, #tpu.memory_space<vmem>>, vector<2x2x512xf32>
    "tpu.trace_start"() <{level = 10 : i32, message = "bkd,btd->bkt"}> : () -> ()
    %cst = arith.constant dense<0.000000e+00> : vector<2x2x50xf32>
    %12 = tpu.matmul %11, %10, %cst {dimension_numbers = #tpu.dot_dimension_numbers<[2], [2], [1], [1], [0, 0, 0, 1, 1, 1], [0], [0]>} : vector<2x2x512xf32>, vector<2x50x512xf32>, vector<2x2x50xf32> -> vector<2x2x50xf32>
    "tpu.trace_stop"() : () -> ()
    %13 = arith.mulf %10, %10 : vector<2x50x512xf32>
    %cst_7 = arith.constant dense<0.000000e+00> : vector<2x50xf32>
    %14 = vector.multi_reduction <add>, %13, %cst_7 [2] : vector<2x50x512xf32> to vector<2x50xf32>
    %15 = math.sqrt %14 : vector<2x50xf32>
    %cst_8 = arith.constant 9.99999993E-9 : f32
    %16 = vector.broadcast %cst_8 : f32 to vector<2x50xf32>
    %17 = arith.maximumf %15, %16 : vector<2x50xf32>
    %cst_9 = arith.constant 1.000000e+00 : f32
    %18 = vector.broadcast %cst_9 : f32 to vector<2x50xf32>
    %19 = arith.divf %18, %17 : vector<2x50xf32>
    %20 = vector.extract_strided_slice %12 {offsets = [0, 1, 0], sizes = [2, 1, 50], strides = [1, 1, 1]} : vector<2x2x50xf32> to vector<2x1x50xf32>
    %21 = vector.shape_cast %20 : vector<2x1x50xf32> to vector<2x50xf32>
    %22 = vector.extract_strided_slice %12 {offsets = [0, 0, 0], sizes = [2, 1, 50], strides = [1, 1, 1]} : vector<2x2x50xf32> to vector<2x1x50xf32>
    %23 = vector.shape_cast %22 : vector<2x1x50xf32> to vector<2x50xf32>
    %24 = arith.subf %21, %23 : vector<2x50xf32>
    %25 = arith.mulf %24, %19 : vector<2x50xf32>
    %26 = arith.mulf %25, %4 : vector<2x50xf32>
    %27 = arith.index_cast %arg0 : i32 to index
    %c0_10 = arith.constant 0 : index
    %c0_11 = arith.constant 0 : index
    %28 = vector.load %arg8[%27, %c0_10, %c0_11] : memref<12x2x50xf32, #tpu.memory_space<vmem>>, vector<1x2x50xf32>
    %29 = vector.shape_cast %28 : vector<1x2x50xf32> to vector<2x50xf32>
    %30 = vector.shape_cast %26 : vector<2x50xf32> to vector<1x2x50xf32>
    tpu.vector_store %arg8[%27, %c0_10, %c0_11], %30 {strides = array<i32>} : memref<12x2x50xf32, #tpu.memory_space<vmem>>, vector<1x2x50xf32>,
    %31 = vector.extract_strided_slice %12 {offsets = [0, 0, 0], sizes = [2, 2, 1], strides = [1, 1, 1]} : vector<2x2x50xf32> to vector<2x2x1xf32>
    %32 = vector.shape_cast %31 : vector<2x2x1xf32> to vector<2x2xf32>
    %33 = vector.extract_strided_slice %15 {offsets = [0, 0], sizes = [2, 1], strides = [1, 1]} : vector<2x50xf32> to vector<2x1xf32>
    %cst_12 = arith.constant 9.99999993E-9 : f32
    %34 = vector.broadcast %cst_12 : f32 to vector<2x1xf32>
    %35 = arith.maximumf %33, %34 : vector<2x1xf32>
    %36 = vector.broadcast %35 : vector<2x1xf32> to vector<2x2xf32>
    %37 = arith.divf %32, %36 : vector<2x2xf32>
    %c0_13 = arith.constant 0 : index
    %c0_14 = arith.constant 0 : index
    %38 = vector.load %arg9[%c0_13, %c0_14] : memref<2x2xf32, #tpu.memory_space<vmem>>, vector<2x2xf32>
    %39 = arith.addf %38, %37 : vector<2x2xf32>
    %c0_15 = arith.constant 0 : index
    %c0_16 = arith.constant 0 : index
    %40 = vector.load %arg9[%c0_15, %c0_16] : memref<2x2xf32, #tpu.memory_space<vmem>>, vector<2x2xf32>
    tpu.vector_store %arg9[%c0_15, %c0_16], %39 {strides = array<i32>} : memref<2x2xf32, #tpu.memory_space<vmem>>, vector<2x2xf32>,
    %c11_i32 = arith.constant 11 : i32
    %41 = arith.cmpi eq, %arg0, %c11_i32 : i32
    %42 = arith.extui %41 : i1 to i32
    %c0_i32_17 = arith.constant 0 : i32
    %43 = arith.cmpi ne, %42, %c0_i32_17 : i32
    scf.if %43 {
      %c0_18 = arith.constant 0 : index
      %c0_19 = arith.constant 0 : index
      %44 = vector.load %arg9[%c0_18, %c0_19] : memref<2x2xf32, #tpu.memory_space<vmem>>, vector<2x2xf32>
      %cst_20 = arith.constant 0.0833333358 : f32
      %45 = vector.broadcast %cst_20 : f32 to vector<2x2xf32>
      %46 = arith.mulf %44, %45 : vector<2x2xf32>
      %c0_21 = arith.constant 0 : index
      %c0_22 = arith.constant 0 : index
      %47 = vector.load %arg5[%c0_21, %c0_22] : memref<2x2xf32, #tpu.memory_space<vmem>>, vector<2x2xf32>
      tpu.vector_store %arg5[%c0_21, %c0_22], %46 {strides = array<i32>} : memref<2x2xf32, #tpu.memory_space<vmem>>, vector<2x2xf32>,
      %c0_23 = arith.constant 0 : index
      %c0_24 = arith.constant 0 : index
      %c0_25 = arith.constant 0 : index
      %48 = vector.load %arg8[%c0_23, %c0_24, %c0_25] : memref<12x2x50xf32, #tpu.memory_space<vmem>>, vector<12x2x50xf32>
      %cst_26 = arith.constant dense<0.000000e+00> : vector<12x2xf32>
      %49 = vector.multi_reduction <add>, %48, %cst_26 [2] : vector<12x2x50xf32> to vector<12x2xf32>
      %50 = vector.shape_cast %49 : vector<12x2xf32> to vector<12x2x1xf32>
      %cst_27 = arith.constant 0.0204081628 : f32
      %51 = vector.broadcast %cst_27 : f32 to vector<12x2x1xf32>
      %52 = arith.mulf %50, %51 : vector<12x2x1xf32>
      %cst_28 = arith.constant dense<0xFF800000> : vector<2x1xf32>
      %53 = vector.multi_reduction <maximumf>, %52, %cst_28 [0] : vector<12x2x1xf32> to vector<2x1xf32>
      %54 = vector.shape_cast %53 : vector<2x1xf32> to vector<1x2x1xf32>
      %55 = vector.broadcast %54 : vector<1x2x1xf32> to vector<12x2x1xf32>
      %56 = arith.subf %52, %55 : vector<12x2x1xf32>
      %57 = math.exp %56 : vector<12x2x1xf32>
      %cst_29 = arith.constant dense<0.000000e+00> : vector<2x1xf32>
      %58 = vector.multi_reduction <add>, %57, %cst_29 [0] : vector<12x2x1xf32> to vector<2x1xf32>
      %59 = vector.shape_cast %58 : vector<2x1xf32> to vector<1x2x1xf32>
      %60 = vector.broadcast %59 : vector<1x2x1xf32> to vector<12x2x1xf32>
      %61 = arith.divf %57, %60 : vector<12x2x1xf32>
      %62 = vector.broadcast %61 : vector<12x2x1xf32> to vector<12x2x50xf32>
      %63 = arith.mulf %48, %62 : vector<12x2x50xf32>
      %cst_30 = arith.constant dense<0.000000e+00> : vector<2x50xf32>
      %64 = vector.multi_reduction <add>, %63, %cst_30 [0] : vector<12x2x50xf32> to vector<2x50xf32>
      %cst_31 = arith.constant 5.000000e-01 : f32
      %65 = vector.broadcast %cst_31 : f32 to vector<2x50xf32>
      %66 = arith.cmpf ogt, %4, %65 : vector<2x50xf32>
      %cst_32 = arith.constant -3.000000e+38 : f32
      %67 = vector.broadcast %cst_32 : f32 to vector<2x50xf32>
      %68 = arith.select %66, %64, %67 : vector<2x50xi1>, vector<2x50xf32>
      %69 = vector.shape_cast %68 : vector<2x50xf32> to vector<1x2x50xf32>
      %cst_33 = arith.constant dense<0xFF800000> : vector<1xf32>
      %70 = vector.multi_reduction <maximumf>, %69, %cst_33 [1, 2] : vector<1x2x50xf32> to vector<1xf32>
      %71 = vector.shape_cast %70 : vector<1xf32> to vector<1x1x1xf32>
      %72 = vector.extract %71[0, 0, 0] : f32 from vector<1x1x1xf32>
      %cst_34 = arith.constant 3.000000e+38 : f32
      %73 = vector.broadcast %cst_34 : f32 to vector<2x50xf32>
      %74 = arith.select %66, %64, %73 : vector<2x50xi1>, vector<2x50xf32>
      %75 = vector.shape_cast %74 : vector<2x50xf32> to vector<1x2x50xf32>
      %cst_35 = arith.constant dense<0x7F800000> : vector<1xf32>
      %76 = vector.multi_reduction <minimumf>, %75, %cst_35 [1, 2] : vector<1x2x50xf32> to vector<1xf32>
      %77 = vector.shape_cast %76 : vector<1xf32> to vector<1x1x1xf32>
      %78 = vector.extract %77[0, 0, 0] : f32 from vector<1x1x1xf32>
      %79 = arith.subf %72, %78 : f32
      %cst_36 = arith.constant 9.99999997E-7 : f32
      %80 = arith.cmpf ogt, %79, %cst_36 : f32
      %cst_37 = arith.constant 1.000000e-30 : f32
      %81 = arith.maximumf %79, %cst_37 : f32
      %cst_38 = arith.constant 1.000000e+00 : f32
      %82 = arith.divf %cst_38, %81 : f32
      %cst_39 = arith.constant 0.000000e+00 : f32
      %83 = arith.select %80, %82, %cst_39 : f32
      %84 = vector.broadcast %78 : f32 to vector<2x50xf32>
      %85 = arith.subf %64, %84 : vector<2x50xf32>
      %86 = vector.broadcast %83 : f32 to vector<2x50xf32>
      %87 = arith.mulf %85, %86 : vector<2x50xf32>
      %88 = vector.extract_strided_slice %87 {offsets = [0, 1], sizes = [2, 7], strides = [1, 1]} : vector<2x50xf32> to vector<2x7xf32>
      %c0_40 = arith.constant 0 : index
      %c0_41 = arith.constant 0 : index
      %c0_42 = arith.constant 0 : index
      %89 = vector.load %arg7[%c0_40, %c0_41, %c0_42] : memref<2x7x7xf32, #tpu.memory_space<vmem>>, vector<2x1x7xf32>
      %90 = vector.shape_cast %89 : vector<2x1x7xf32> to vector<2x7xf32>
      %91 = vector.shape_cast %88 : vector<2x7xf32> to vector<2x1x7xf32>
      tpu.vector_store %arg7[%c0_40, %c0_41, %c0_42], %91 {strides = array<i32>} : memref<2x7x7xf32, #tpu.memory_space<vmem>>, vector<2x1x7xf32>,
      %92 = vector.extract_strided_slice %87 {offsets = [0, 8], sizes = [2, 7], strides = [1, 1]} : vector<2x50xf32> to vector<2x7xf32>
      %c0_43 = arith.constant 0 : index
      %c1 = arith.constant 1 : index
      %c0_44 = arith.constant 0 : index
      %93 = vector.load %arg7[%c0_43, %c1, %c0_44] : memref<2x7x7xf32, #tpu.memory_space<vmem>>, vector<2x1x7xf32>
      %94 = vector.shape_cast %93 : vector<2x1x7xf32> to vector<2x7xf32>
      %95 = vector.shape_cast %92 : vector<2x7xf32> to vector<2x1x7xf32>
      tpu.vector_store %arg7[%c0_43, %c1, %c0_44], %95 {strides = array<i32>} : memref<2x7x7xf32, #tpu.memory_space<vmem>>, vector<2x1x7xf32>,
      %96 = vector.extract_strided_slice %87 {offsets = [0, 15], sizes = [2, 7], strides = [1, 1]} : vector<2x50xf32> to vector<2x7xf32>
      %c0_45 = arith.constant 0 : index
      %c2 = arith.constant 2 : index
      %c0_46 = arith.constant 0 : index
      %97 = vector.load %arg7[%c0_45, %c2, %c0_46] : memref<2x7x7xf32, #tpu.memory_space<vmem>>, vector<2x1x7xf32>
      %98 = vector.shape_cast %97 : vector<2x1x7xf32> to vector<2x7xf32>
      %99 = vector.shape_cast %96 : vector<2x7xf32> to vector<2x1x7xf32>
      tpu.vector_store %arg7[%c0_45, %c2, %c0_46], %99 {strides = array<i32>} : memref<2x7x7xf32, #tpu.memory_space<vmem>>, vector<2x1x7xf32>,
      %100 = vector.extract_strided_slice %87 {offsets = [0, 22], sizes = [2, 7], strides = [1, 1]} : vector<2x50xf32> to vector<2x7xf32>
      %c0_47 = arith.constant 0 : index
      %c3 = arith.constant 3 : index
      %c0_48 = arith.constant 0 : index
      %101 = vector.load %arg7[%c0_47, %c3, %c0_48] : memref<2x7x7xf32, #tpu.memory_space<vmem>>, vector<2x1x7xf32>
      %102 = vector.shape_cast %101 : vector<2x1x7xf32> to vector<2x7xf32>
      %103 = vector.shape_cast %100 : vector<2x7xf32> to vector<2x1x7xf32>
      tpu.vector_store %arg7[%c0_47, %c3, %c0_48], %103 {strides = array<i32>} : memref<2x7x7xf32, #tpu.memory_space<vmem>>, vector<2x1x7xf32>,
      %104 = vector.extract_strided_slice %87 {offsets = [0, 29], sizes = [2, 7], strides = [1, 1]} : vector<2x50xf32> to vector<2x7xf32>
      %c0_49 = arith.constant 0 : index
      %c4 = arith.constant 4 : index
      %c0_50 = arith.constant 0 : index
      %105 = vector.load %arg7[%c0_49, %c4, %c0_50] : memref<2x7x7xf32, #tpu.memory_space<vmem>>, vector<2x1x7xf32>
      %106 = vector.shape_cast %105 : vector<2x1x7xf32> to vector<2x7xf32>
      %107 = vector.shape_cast %104 : vector<2x7xf32> to vector<2x1x7xf32>
      tpu.vector_store %arg7[%c0_49, %c4, %c0_50], %107 {strides = array<i32>} : memref<2x7x7xf32, #tpu.memory_space<vmem>>, vector<2x1x7xf32>,
      %108 = vector.extract_strided_slice %87 {offsets = [0, 36], sizes = [2, 7], strides = [1, 1]} : vector<2x50xf32> to vector<2x7xf32>
      %c0_51 = arith.constant 0 : index
      %c5 = arith.constant 5 : index
      %c0_52 = arith.constant 0 : index
      %109 = vector.load %arg7[%c0_51, %c5, %c0_52] : memref<2x7x7xf32, #tpu.memory_space<vmem>>, vector<2x1x7xf32>
      %110 = vector.shape_cast %109 : vector<2x1x7xf32> to vector<2x7xf32>
      %111 = vector.shape_cast %108 : vector<2x7xf32> to vector<2x1x7xf32>
      tpu.vector_store %arg7[%c0_51, %c5, %c0_52], %111 {strides = array<i32>} : memref<2x7x7xf32, #tpu.memory_space<vmem>>, vector<2x1x7xf32>,
      %112 = vector.extract_strided_slice %87 {offsets = [0, 43], sizes = [2, 7], strides = [1, 1]} : vector<2x50xf32> to vector<2x7xf32>
      %c0_53 = arith.constant 0 : index
      %c6 = arith.constant 6 : index
      %c0_54 = arith.constant 0 : index
      %113 = vector.load %arg7[%c0_53, %c6, %c0_54] : memref<2x7x7xf32, #tpu.memory_space<vmem>>, vector<2x1x7xf32>
      %114 = vector.shape_cast %113 : vector<2x1x7xf32> to vector<2x7xf32>
      %115 = vector.shape_cast %112 : vector<2x7xf32> to vector<2x1x7xf32>
      tpu.vector_store %arg7[%c0_53, %c6, %c0_54], %115 {strides = array<i32>} : memref<2x7x7xf32, #tpu.memory_space<vmem>>, vector<2x1x7xf32>,
      %c0_55 = arith.constant 0 : index
      %c0_56 = arith.constant 0 : index
      %c0_57 = arith.constant 0 : index
      %116 = vector.load %arg7[%c0_55, %c0_56, %c0_57] : memref<2x7x7xf32, #tpu.memory_space<vmem>>, vector<2x7x7xf32>
      %c0_58 = arith.constant 0 : index
      %c0_59 = arith.constant 0 : index
      %c0_60 = arith.constant 0 : index
      %117 = vector.load %arg4[%c0_58, %c0_59, %c0_60] : memref<2x7x224xf32, #tpu.memory_space<vmem>>, vector<2x7x224xf32>
      "tpu.trace_start"() <{level = 10 : i32, message = "bhw,bwq->bhq"}> : () -> ()
      %cst_61 = arith.constant dense<0.000000e+00> : vector<2x7x224xf32>
      %118 = tpu.matmul %116, %117, %cst_61 {dimension_numbers = #tpu.dot_dimension_numbers<[2], [1], [1], [2], [0, 0, 0, 1, 1, 2], [0], [0]>} : vector<2x7x7xf32>, vector<2x7x224xf32>, vector<2x7x224xf32> -> vector<2x7x224xf32>
      "tpu.trace_stop"() : () -> ()
      %c0_62 = arith.constant 0 : index
      %c0_63 = arith.constant 0 : index
      %c0_64 = arith.constant 0 : index
      %119 = vector.load %arg3[%c0_62, %c0_63, %c0_64] : memref<2x224x7xf32, #tpu.memory_space<vmem>>, vector<2x224x7xf32>
      "tpu.trace_start"() <{level = 10 : i32, message = "boh,bhq->boq"}> : () -> ()
      %cst_65 = arith.constant dense<0.000000e+00> : vector<2x224x224xf32>
      %120 = tpu.matmul %119, %118, %cst_65 {dimension_numbers = #tpu.dot_dimension_numbers<[2], [1], [1], [2], [0, 0, 0, 1, 1, 2], [0], [0]>} : vector<2x224x7xf32>, vector<2x7x224xf32>, vector<2x224x224xf32> -> vector<2x224x224xf32>
      "tpu.trace_stop"() : () -> ()
      %c0_66 = arith.constant 0 : index
      %c0_67 = arith.constant 0 : index
      %c0_68 = arith.constant 0 : index
      %121 = vector.load %arg6[%c0_66, %c0_67, %c0_68] : memref<2x224x224xf32, #tpu.memory_space<vmem>>, vector<2x224x224xf32>
      tpu.vector_store %arg6[%c0_66, %c0_67, %c0_68], %120 {strides = array<i32>} : memref<2x224x224xf32, #tpu.memory_space<vmem>>, vector<2x224x224xf32>,
    } else {
    }
    return
  }
  func.func @transform_0(%arg0: i32) -> (i32, i32, i32, i32) {
    %c0_i32 = arith.constant 0 : i32
    %c0_i32_0 = arith.constant 0 : i32
    %c0_i32_1 = arith.constant 0 : i32
    %c0_i32_2 = arith.constant 0 : i32
    return %arg0, %c0_i32, %c0_i32_0, %c0_i32_1 : i32, i32, i32, i32
  }
  func.func @transform_1(%arg0: i32) -> (i32, i32, i32) {
    %c0_i32 = arith.constant 0 : i32
    %c0_i32_0 = arith.constant 0 : i32
    %c0_i32_1 = arith.constant 0 : i32
    %c0_i32_2 = arith.constant 0 : i32
    return %c0_i32, %c0_i32_0, %c0_i32_1 : i32, i32, i32
  }
  func.func @transform_2(%arg0: i32) -> (i32, i32, i32) {
    %c0_i32 = arith.constant 0 : i32
    %c0_i32_0 = arith.constant 0 : i32
    %c0_i32_1 = arith.constant 0 : i32
    %c0_i32_2 = arith.constant 0 : i32
    return %c0_i32, %c0_i32_0, %c0_i32_1 : i32, i32, i32
  }
  func.func @transform_3(%arg0: i32) -> (i32, i32, i32) {
    %c0_i32 = arith.constant 0 : i32
    %c0_i32_0 = arith.constant 0 : i32
    %c0_i32_1 = arith.constant 0 : i32
    %c0_i32_2 = arith.constant 0 : i32
    return %c0_i32, %c0_i32_0, %c0_i32_1 : i32, i32, i32
  }
  func.func @transform_4(%arg0: i32) -> (i32, i32) {
    %c0_i32 = arith.constant 0 : i32
    %c0_i32_0 = arith.constant 0 : i32
    %c0_i32_1 = arith.constant 0 : i32
    return %c0_i32, %c0_i32_0 : i32, i32
  }
  func.func @transform_5(%arg0: i32) -> (i32, i32, i32) {
    %c0_i32 = arith.constant 0 : i32
    %c0_i32_0 = arith.constant 0 : i32
    %c0_i32_1 = arith.constant 0 : i32
    %c0_i32_2 = arith.constant 0 : i32
    return %c0_i32, %c0_i32_0, %c0_i32_1 : i32, i32, i32
  }
  func.func @transform_6(%arg0: i32) -> (i32, i32, i32) {
    %c0_i32 = arith.constant 0 : i32
    %c0_i32_0 = arith.constant 0 : i32
    %c0_i32_1 = arith.constant 0 : i32
    %c0_i32_2 = arith.constant 0 : i32
    return %c0_i32, %c0_i32_0, %c0_i32_1 : i32, i32, i32
  }
}

</mosaic_0001>

<bundles_post_ra>
// kernel: anomaly_forward.1
= control target key start
LH: loop header
LB: loop body
LE: loop exit
PB: predicated region body
PF: predicated region fallthrough
CT: control target
= control target key end

     0   :  { %12 = vsyncpa [#allocation5], 0  ;;  %s3868_s0 = inlined_call_operand.vmem [shape: bf16[12,2,50,512], index: 0, kind: input, shape index: {}]   ;;  %s3869_s1 = inlined_call_operand.vmem [shape: f32[2,2,512], index: 1, kind: input, shape index: {}]   ;;  %s3870_s2 = inlined_call_operand.vmem [shape: f32[2,224,7], index: 2, kind: input, shape index: {}]   ;;  %s3871_s3 = inlined_call_operand.vmem [shape: f32[2,7,224], index: 3, kind: input, shape index: {}]   ;;  %s3872_s4 = inlined_call_operand.hbm [shape: f32[2,2], index: 4, kind: output, shape index: {0}]   ;;  %s3873_s5 = inlined_call_operand.hbm [shape: f32[2,224,224], index: 5, kind: output, shape index: {1}]   ;;  %s3874_s6 = inlined_call_operand.vmem [shape: f32[2,7,7], index: 6, kind: output, shape index: {2}]  }
   0x1   :  { %13 = vsyncpa [#allocation7], 0  ;;  %s2799_s21 = smov 0  }
   0x2 LB: > { %s2805_s22 = sadd.s32 4294967295, %s2744_s21   ;;  %p2467_p0 = scmp.ge.s32.totalorder %s2744_s21, 1  ;;  %s2744_s21 = sphi %s2799_s21, %s19_s21  }
   0x3   : > { %p204_p1 = scmp.lt.s32.totalorder %s2744_s21, 13 }
   0x5   : > { %p205_p2 = pnand %p2467_p0, %p204_p1 }
   0x7   : > { %208 = sbr.rel (%p205_p2) target bundleno = 1622 (0x656), region = 36 }
   0xc   : > { %p229_p3 = scmp.lt.s32.totalorder %s2805_s22, 11  ;;  %v234_v0 = vlaneseq  ;;  %v2746_v2 = vmov 0.0   ;;  %p2470_p4 = scmp.ne.s32.totalorder %s2805_s22, 0 }
   0xe   : > { %s230_s23 = scalar_select %p229_p3, %s2805_s22, 11  ;;  %v2812_v1 = vand.u32 127, %v234_v0 }
   0xf   : > { %242 = sbr.rel (%p2470_p4) target bundleno = 22 (0x16), region = 40 }
  0x10   : > { %3886 = vst [vmem:[#allocation10_spill] sm:$0xff] %v2812_v1  ;;  %s2545_s24 = smul.u32 224, %s230_s23  ;;  %vm236_vm0 = vcmp.ge.s32.totalorder %v2812_v1, 1 }
  0x11   : > { %v2815_v3 = vsel %vm236_vm0, 1.0, %v2746_v2 }
  0x12   : > { %3887 = vst [vmem:[#allocation11_spill] sm:$0xff] %v2815_v3  ;;  %s2820_s27 = scalar_lea.vmem %s3868_s0, %s2545_s24 }
  0x14   : > { %vm243_vm1 = vcmask 9216   ;;  %v2747_v4 = vmov 0.0  }
  0x15   : > { %244 = vst.msk [vmem:[#allocation3] sm:$0x3] %vm243_vm1, %v2747_v4 }
  0x16 PF: > { %v257_v5 = vld [vmem:[%s2820_s27 + $0x60] sm:$0x11]  ;;  %v258_v6 = vld [vmem:[%s2820_s27 + $0x68] sm:$0x11]  ;;  %v255_v7 = vld [vmem:[%s2820_s27 + $0x50] sm:$0xff]  ;;  %v2915_v2 = vshrl.u32 %v234_v0, 7 }
  0x17   : > { %v298_v8 = vunpack.c.h.bf16 %v257_v5  ;;  %v300_v9 = vunpack.c.h.bf16 %v258_v6  ;;  %v297_v10 = vunpack.c.l.bf16 %v257_v5  ;;  %v299_v11 = vunpack.c.l.bf16 %v258_v6  ;;  %v256_v12 = vld [vmem:[%s2820_s27 + $0x58] sm:$0xff]  ;;  %v253_v13 = vld [vmem:[%s2820_s27 + $0x40] sm:$0xff]  ;;  %v254_v16 = vld [vmem:[%s2820_s27 + $0x48] sm:$0xff]  ;;  %s2471_s8 = sshll.u32 %s2805_s22, 1  ;;  %p2472_p5 = scmp.ne.s32.totalorder %s2805_s22, 11 }
  0x18   : > { %v294_v14 = vunpack.c.h.bf16 %v255_v7  ;;  %v2828_v15 = vunpack.c.h.bf16 %v256_v12  ;;  %v293_v18 = vunpack.c.l.bf16 %v255_v7  ;;  %v2833_v19 = vunpack.c.l.bf16 %v256_v12  ;;  %v251_v20 = vld [vmem:[%s2820_s27 + $0x30] sm:$0xff]  ;;  %v252_v25 = vld [vmem:[%s2820_s27 + $0x38] sm:$0xff]  ;;  %v249_v26 = vld [vmem:[%s2820_s27 + $0x20] sm:$0xff]  ;;  %3888 = vst [vmem:[#allocation12_spill] sm:$0xff] %v2915_v2  ;;  %s1045_s9 = scalar_lea.vmem [#allocation2], %s2471_s8  ;;  %s2752_s16 = smov (!%p2472_p5), 120  }
  0x19   : > { %371 = vmatprep.subr.mxu0 %v298_v8  ;;  %v2831_v17 = vmul.f32 %v298_v8, %v298_v8  ;;  %441 = vmatprep.subr.mxu1 %v300_v9  ;;  %v2836_v21 = vmul.f32 %v300_v9, %v300_v9  ;;  %v2838_v22 = vmul.f32 %v297_v10, %v297_v10  ;;  %v290_v24 = vunpack.c.h.bf16 %v253_v13  ;;  %v250_v31 = vld [vmem:[%s2820_s27 + $0x28] sm:$0xff]  ;;  %v247_v36 = vld [vmem:[%s2820_s27 + $0x10] sm:$0xff]  ;;  %v248_v37 = vld [vmem:[%s2820_s27 + $0x18] sm:$0xff]  ;;  %s2750_s13 = smov (!%p2472_p5), 1e-30   ;;  %s2753_s17 = smov (!%p2472_p5), 127  }
  0x1a   : > { %372 = vmatpush1.xpose.msra.mxu0 %v297_v10  ;;  %442 = vmatpush1.xpose.msra.mxu1 %v299_v11  ;;  %v2840_v23 = vmul.f32 %v299_v11, %v299_v11  ;;  %v2844_v27 = vmul.f32 %v294_v14, %v294_v14  ;;  %v2847_v28 = vmul.f32 %v293_v18, %v293_v18  ;;  %v2849_v29 = vunpack.c.h.bf16 %v254_v16  ;;  %v245_v42 = vld [vmem:[%s2820_s27] sm:$0xff]  ;;  %v246_v47 = vld [vmem:[%s2820_s27 + $0x8] sm:$0xff]  ;;  %v271_v5 = vld [vmem:[%s2820_s27 + $0xd0] sm:$0x11]  ;;  %s2754_s18 = smov (!%p2472_p5), 113   ;;  %s2755_s19 = smov (!%p2472_p5), 106  }
  0x1b   : > { %373 = vmatprep.subr.mxu0 %v294_v14  ;;  %443 = vmatprep.subr.mxu1 %v2828_v15  ;;  %v289_v30 = vunpack.c.l.bf16 %v253_v13  ;;  %v2852_v32 = vmul.f32 %v290_v24, %v290_v24  ;;  %v2854_v33 = vunpack.c.l.bf16 %v254_v16  ;;  %v286_v34 = vunpack.c.h.bf16 %v251_v20  ;;  %v329_v56 = vld [vmem:[%s3869_s1] sm:$0xff]  ;;  %v262_v62 = vld [vmem:[%s2820_s27 + $0x88] sm:$0xff]  ;;  %v272_v14 = vld [vmem:[%s2820_s27 + $0xd8] sm:$0x11]  ;;  %s2756_s26 = smov (!%p2472_p5), 99   ;;  %s2758_s7 = smov (!%p2472_p5), 92  }
  0x1c   : > { %v285_v35 = vunpack.c.l.bf16 %v251_v20  ;;  %v2860_v39 = vunpack.c.h.bf16 %v252_v25  ;;  %v2862_v40 = vunpack.c.l.bf16 %v252_v25  ;;  %v282_v41 = vunpack.c.h.bf16 %v249_v26  ;;  %v261_v61 = vld [vmem:[%s2820_s27 + $0x80] sm:$0xff]  ;;  %v259_v25 = vld [vmem:[%s2820_s27 + $0x70] sm:$0xff]  ;;  %s2759_s8 = smov (!%p2472_p5), 85  }
  0x1d   : > { %v2858_v38 = vmul.f32 %v289_v30, %v289_v30  ;;  %v2866_v43 = vmul.f32 %v286_v34, %v286_v34  ;;  %v2870_v45 = vunpack.c.h.bf16 %v250_v31  ;;  %v2872_v46 = vunpack.c.l.bf16 %v249_v26 }
  0x1e   : > { %374 = vmatpush1.xpose.msra.mxu0 %v293_v18  ;;  %444 = vmatpush1.xpose.msra.mxu1 %v2833_v19  ;;  %v2868_v44 = vmul.f32 %v285_v35, %v285_v35  ;;  %v2876_v48 = vmul.f32 %v282_v41, %v282_v41  ;;  %v2878_v49 = vunpack.c.l.bf16 %v250_v31  ;;  %v2880_v50 = vunpack.c.h.bf16 %v247_v36 }
  0x1f   : > { %375 = vmatprep.subr.mxu0 %v290_v24  ;;  %445 = vmatprep.subr.mxu1 %v2849_v29  ;;  %v2882_v51 = vunpack.c.h.bf16 %v248_v37  ;;  %v2886_v52 = vmul.f32 %v2872_v46, %v2872_v46  ;;  %v2888_v53 = vunpack.c.l.bf16 %v247_v36  ;;  %v2890_v54 = vunpack.c.l.bf16 %v248_v37 }
  0x20   : > { %v2892_v55 = vunpack.c.h.bf16 %v245_v42  ;;  %v2899_v57 = vmul.f32 %v2880_v50, %v2880_v50  ;;  %v2901_v58 = vunpack.c.h.bf16 %v246_v47  ;;  %v2903_v59 = vunpack.c.l.bf16 %v245_v42 }
  0x21   : > { %v2905_v60 = vunpack.c.l.bf16 %v246_v47  ;;  %v2912_v63 = vmul.f32 %v2888_v53, %v2888_v53  ;;  %v2748_v6 = vmov 1983009808   ;;  %v332_v8 = vcombine.high %v329_v56, %v329_v56  ;;  %v260_v47 = vld [vmem:[%s2820_s27 + $0x78] sm:$0xff] }
  0x22   : > { %376 = vmatpush1.xpose.msra.mxu0 %v289_v30  ;;  %446 = vmatpush1.xpose.msra.mxu1 %v2854_v33  ;;  %v656_v4 = vmul.f32 %v2892_v55, %v2892_v55  ;;  %v334_v7 = vunpack.c.l.s4 %v2748_v6  ;;  %v655_v9 = vmul.f32 %v2903_v59, %v2903_v59  ;;  %v2925_v11 = vunpack.c.l.bf16 %v261_v61 }
  0x23   : > { %377 = vmatprep.subr.mxu0 %v286_v34  ;;  %447 = vmatprep.subr.mxu1 %v2860_v39  ;;  %v657_v10 = vmul.f32 %v2905_v60, %v2905_v60  ;;  %v2927_v0 = vunpack.c.h.bf16 %v261_v61  ;;  %v2929_v12 = vunpack.c.l.bf16 %v262_v62  ;;  %v2931_v13 = vunpack.c.h.bf16 %v262_v62 }
  0x24   : > { %3889 = vst [vmem:[#allocation13_spill] sm:$0xff] %v2925_v11  ;;  %v335_v16 = vunpack.c.0.s8 %v334_v7  ;;  %v658_v18 = vmul.f32 %v2901_v58, %v2901_v58  ;;  %v711_v20 = vadd.f32 %v656_v4, %v655_v9  ;;  %v2936_v24 = vunpack.c.l.bf16 %v271_v5 }
  0x25   : > { %3890 = vst [vmem:[#allocation14_spill] sm:$0xff] %v2929_v12  ;;  %v687_v26 = vmul.f32 %v2925_v11, %v2925_v11  ;;  %v688_v30 = vmul.f32 %v2927_v0, %v2927_v0  ;;  %v689_v31 = vmul.f32 %v2929_v12, %v2929_v12  ;;  %v2946_v34 = vunpack.c.h.bf16 %v271_v5  ;;  %v263_v5 = vld [vmem:[%s2820_s27 + $0x90] sm:$0xff]  ;;  %v268_v11 = vld [vmem:[%s2820_s27 + $0xb8] sm:$0xff] }
  0x26   : > { %378 = vmatpush1.xpose.msra.mxu0 %v285_v35  ;;  %448 = vmatpush1.xpose.msra.mxu1 %v2862_v40  ;;  %v2950_v36 = vsub.s32 %v335_v16, %v2915_v2  ;;  %v712_v35 = vadd.f32 %v711_v20, %v657_v10  ;;  %v690_v37 = vmul.f32 %v2931_v13, %v2931_v13  ;;  %v2954_v42 = vunpack.c.l.bf16 %v272_v14 }
  0x27   : > { %379 = vmatprep.subr.mxu0 %v282_v41  ;;  %449 = vmatprep.subr.mxu1 %v2870_v45  ;;  %v756_v61 = vadd.f32 %v688_v30, %v687_v26  ;;  %v2959_v62 = vmul.f32 %v2936_v24, %v2936_v24  ;;  %v2961_v4 = vunpack.c.h.bf16 %v272_v14  ;;  %v2963_v41 = vunpack.c.l.bf16 %v259_v25  ;;  %v264_v26 = vld [vmem:[%s2820_s27 + $0x98] sm:$0xff]  ;;  %v269_v30 = vld [vmem:[%s2820_s27 + $0xc0] sm:$0xff] }
  0x28   : > { %v2967_v6 = vrot.slane %v329_v56, %v2950_v36  ;;  %v2970_v7 = vrot.slane %v332_v8, %v2950_v36  ;;  %v713_v9 = vadd.f32 %v712_v35, %v658_v18  ;;  %v2972_v10 = vunpack.c.h.bf16 %v259_v25 }
  0x29   : > { %3891 = vst [vmem:[#allocation15_spill] sm:$0xff] %v2963_v41  ;;  %v757_v16 = vadd.f32 %v756_v61, %v689_v31  ;;  %v2976_v14 = vunpack.c.l.bf16 %v260_v47  ;;  %v2978_v20 = vunpack.c.h.bf16 %v260_v47  ;;  %v683_v56 = vmul.f32 %v2963_v41, %v2963_v41  ;;  %v270_v61 = vld [vmem:[%s2820_s27 + $0xc8] sm:$0xff]  ;;  %v267_v41 = vld [vmem:[%s2820_s27 + $0xb0] sm:$0xff] }
  0x2a   : > { %3892 = vst [vmem:[#allocation16_spill] sm:$0xff] %v2972_v10  ;;  %380 = vmatpush1.xpose.msra.mxu0 %v2872_v46  ;;  %450 = vmatpush1.xpose.msra.mxu1 %v2878_v49  ;;  %v347_v8 = vcombine.high %v2967_v6, %v2967_v6  ;;  %v348_v46 = vcombine.high %v2970_v7, %v2970_v7  ;;  %v2991_v25 = vunpack.c.l.bf16 %v263_v5  ;;  %v2998_v47 = vunpack.c.h.bf16 %v263_v5 }
  0x2b   : > { %3893 = vst [vmem:[#allocation17_spill] sm:$0xff] %v2976_v14  ;;  %3894 = vst [vmem:[#allocation18_spill] sm:$0xff] %v2978_v20  ;;  %381 = vmatprep.subr.mxu0 %v2880_v50  ;;  %451 = vmatprep.subr.mxu1 %v2882_v51  ;;  %v684_v18 = vmul.f32 %v2972_v10, %v2972_v10  ;;  %v758_v31 = vadd.f32 %v757_v16, %v690_v37  ;;  %v3001_v1 = vunpack.c.l.bf16 %v264_v26  ;;  %vm741_vm2 = vcmask 1041408  }
  0x2c   : > { %714 = vadd.xlane.f32.xlu0 %v713_v9  ;;  %v685_v35 = vmul.f32 %v2976_v14, %v2976_v14  ;;  %v686_v50 = vmul.f32 %v2978_v20, %v2978_v20  ;;  %417 = vmatprep.mubr.f32.mxu0 %v347_v8  ;;  %v3003_v2 = vunpack.c.h.bf16 %v264_v26  ;;  %v691_v37 = vmul.f32 %v2991_v25, %v2991_v25  ;;  %v265_v26 = vld [vmem:[%s2820_s27 + $0xa0] sm:$0xff]  ;;  %v266_v14 = vld [vmem:[%s2820_s27 + $0xa8] sm:$0xff] }
  0x2d   : > { %487 = vmatprep.mubr.f32.mxu1 %v348_v46  ;;  %v751_v3 = vadd.f32 %v684_v18, %v683_v56  ;;  %v3011_v5 = vmul.f32 %v2946_v34, %v2946_v34  ;;  %v692_v9 = vmul.f32 %v2998_v47, %v2998_v47  ;;  %v3015_v16 = vunpack.c.l.bf16 %v269_v30  ;;  %759 = vadd.xlane.f32.xlu1 %v758_v31 }
  0x2e   : > { %382 = vmatpush1.xpose.msra.mxu0 %v2888_v53  ;;  %452 = vmatpush1.xpose.msra.mxu1 %v2890_v54  ;;  %v322_v56 = vunpack.c.h.bf16 %v269_v30  ;;  %v693_v53 = vmul.f32 %v3001_v1, %v3001_v1  ;;  %v694_v46 = vmul.f32 %v3003_v2, %v3003_v2  ;;  %v3024_v18 = vunpack.c.h.bf16 %v270_v61 }
  0x2f   : > { %383 = vmatprep.subr.mxu0 %v2892_v55  ;;  %453 = vmatprep.subr.mxu1 %v2901_v58  ;;  %v752_v8 = vadd.f32 %v751_v3, %v685_v35  ;;  %v761_v20 = vadd.f32 %v692_v9, %v691_v37  ;;  %v661_v55 = vmul.f32 %v2890_v54, %v2890_v54  ;;  %v3036_v10 = vunpack.c.l.bf16 %v265_v26 }
  0x30   : > { %v3028_v30 = vmul.f32 %v322_v56, %v322_v56  ;;  %v662_v3 = vmul.f32 %v2882_v51, %v2882_v51  ;;  %v716_v35 = vadd.f32 %v2899_v57, %v2912_v63  ;;  %v3038_v12 = vunpack.c.h.bf16 %v265_v26 }
  0x31   : > { %v753_v58 = vadd.f32 %v752_v8, %v686_v50  ;;  %v762_v31 = vadd.f32 %v761_v20, %v693_v53  ;;  %v3043_v37 = vunpack.c.l.bf16 %v266_v14  ;;  %v3045_v54 = vunpack.c.h.bf16 %v266_v14 }
  0x32   : > { %384 = vmatpush1.xpose.msra.mxu0 %v2903_v59  ;;  %454 = vmatpush1.xpose.msra.mxu1 %v2905_v60  ;;  %v317_v9 = vunpack.c.l.bf16 %v267_v41  ;;  %v717_v51 = vadd.f32 %v716_v35, %v661_v55  ;;  %v695_v57 = vmul.f32 %v3036_v10, %v3036_v10  ;;  %v696_v63 = vmul.f32 %v3038_v12, %v3038_v12 }
  0x33   : > { %533 = vmatprep.subr.mxu0 %v2946_v34  ;;  %603 = vmatprep.subr.mxu1 %v2961_v4  ;;  %v318_v59 = vunpack.c.h.bf16 %v267_v41  ;;  %v763_v60 = vadd.f32 %v762_v31, %v694_v46  ;;  %v697_v20 = vmul.f32 %v3043_v37, %v3043_v37  ;;  %v698_v14 = vmul.f32 %v3045_v54, %v3045_v54 }
  0x34   : > { %754 = vadd.xlane.f32.xlu0 %v753_v58  ;;  %v319_v50 = vunpack.c.l.bf16 %v268_v11  ;;  %v718_v34 = vadd.f32 %v717_v51, %v662_v3  ;;  %v766_v26 = vadd.f32 %v696_v63, %v695_v57  ;;  %v320_v53 = vunpack.c.h.bf16 %v268_v11 }
  0x35   : > { %418 = vmatmul.mubr.f32.vlgmr.msra.gmra.mxu0 %v2967_v6  ;;  %488 = vmatmul.mubr.f32.vlgmr.msra.gmra.mxu1 %v2970_v7  ;;  %v700_v8 = vmul.f32 %v318_v59, %v318_v59  ;;  %v323_v41 = vunpack.c.l.bf16 %v270_v61  ;;  %v665_v46 = vmul.f32 %v2878_v49, %v2878_v49  ;;  %v666_v55 = vmul.f32 %v2870_v45, %v2870_v45 }
  0x36   : > { %534 = vmatpush1.xpose.msra.mxu0 %v2936_v24  ;;  %604 = vmatpush1.xpose.msra.mxu1 %v2954_v42  ;;  %v721_v6 = vadd.f32 %v2876_v48, %v2886_v52  ;;  %v767_v7 = vadd.f32 %v766_v26, %v697_v20  ;;  %v699_v3 = vmul.f32 %v317_v9, %v317_v9  ;;  %v743_v24 = vsel %vm741_vm2, %v2831_v17, 0.0 }
  0x37   : > { %764 = vadd.xlane.f32.xlu1 %v763_v60  ;;  %535 = vmatprep.subr.mxu0 %v322_v56  ;;  %v701_v11 = vmul.f32 %v319_v50, %v319_v50  ;;  %v702_v49 = vmul.f32 %v320_v53, %v320_v53  ;;  %v669_v45 = vmul.f32 %v2862_v40, %v2862_v40  ;;  %v781_v51 = vsel %vm741_vm2, %v2959_v62, 0.0 }
  0x38   : > { %605 = vmatprep.subr.mxu1 %v3024_v18  ;;  %719 = vadd.xlane.f32.xlu0 %v718_v34  ;;  %v722_v61 = vadd.f32 %v721_v6, %v665_v46  ;;  %v768_v58 = vadd.f32 %v767_v7, %v698_v14  ;;  %v771_v35 = vadd.f32 %v700_v8, %v699_v3 }
  0x39   : > { %v670_v48 = vmul.f32 %v2860_v39, %v2860_v39  ;;  %v726_v52 = vadd.f32 %v2866_v43, %v2868_v44  ;;  %v703_v56 = vmul.f32 %v3015_v16, %v3015_v16  ;;  %v705_v31 = vmul.f32 %v323_v41, %v323_v41 }
  0x3a   : > { %536 = vmatpush1.xpose.msra.mxu0 %v3015_v16  ;;  %606 = vmatpush1.xpose.msra.mxu1 %v323_v41  ;;  %v723_v17 = vadd.f32 %v722_v61, %v666_v55  ;;  %v772_v40 = vadd.f32 %v771_v35, %v701_v11  ;;  %v706_v39 = vmul.f32 %v3024_v18, %v3024_v18  ;;  %v782_v43 = vsel %vm741_vm2, %v3011_v5, 0.0 }
  0x3b   : > { %769 = vadd.xlane.f32.xlu1 %v768_v58  ;;  %537 = vmatprep.subr.mxu0 %v318_v59  ;;  %v727_v57 = vadd.f32 %v726_v52, %v669_v45  ;;  %v742_v44 = vsel %vm741_vm2, %v2838_v22, 0.0  ;;  %v776_v16 = vadd.f32 %v3028_v30, %v703_v56  ;;  %v673_v62 = vmul.f32 %v2854_v33, %v2854_v33 }
  0x3c   : > { %607 = vmatprep.subr.mxu1 %v320_v53  ;;  %724 = vadd.xlane.f32.xlu0 %v723_v17  ;;  %v674_v63 = vmul.f32 %v2849_v29, %v2849_v29  ;;  %v773_v59 = vadd.f32 %v772_v40, %v702_v49  ;;  %v731_v18 = vadd.f32 %v2852_v32, %v2858_v38  ;;  %v745_v33 = vsel %vm741_vm2, %v2840_v23, 0.0  ;;  %v330_v29 = vld [vmem:[%s3869_s1 + $0x8] sm:$0xff] }
  0x3d   : > { %v728_v60 = vadd.f32 %v727_v57, %v670_v48  ;;  %v709_v5 = vmul.f32 %v2954_v42, %v2954_v42  ;;  %v777_v22 = vadd.f32 %v776_v16, %v705_v31  ;;  %v710_v30 = vmul.f32 %v2961_v4, %v2961_v4 }
  0x3e   : > { %538 = vmatpush1.xpose.msra.mxu0 %v317_v9  ;;  %608 = vmatpush1.xpose.msra.mxu1 %v319_v50  ;;  %v783_v20 = vadd.f32 %v782_v43, %v781_v51  ;;  %v732_v32 = vadd.f32 %v731_v18, %v673_v62  ;;  %v677_v42 = vmul.f32 %v2833_v19, %v2833_v19 }
  0x3f   : > { %774 = vadd.xlane.f32.xlu1 %v773_v59  ;;  %539 = vmatprep.subr.mxu0 %v3038_v12  ;;  %v784_v38 = vsel %vm741_vm2, %v709_v5, 0.0  ;;  %v678_v4 = vmul.f32 %v2828_v15, %v2828_v15  ;;  %v778_v23 = vadd.f32 %v777_v22, %v706_v39  ;;  %v786_v14 = vsel %vm741_vm2, %v710_v30, 0.0  ;;  %v3901_v39 = vld [vmem:[#allocation12_spill] sm:$0xff] }
  0x40   : > { %609 = vmatprep.subr.mxu1 %v3045_v54  ;;  %729 = vadd.xlane.f32.xlu0 %v728_v60  ;;  %v785_v9 = vadd.f32 %v784_v38, %v783_v20  ;;  %v736_v50 = vadd.f32 %v2844_v27, %v2847_v28  ;;  %v733_v12 = vadd.f32 %v732_v32, %v674_v63  ;;  %v747_v28 = vsel %vm741_vm2, %v2836_v21, 0.0  ;;  %v3897_v21 = vld [vmem:[#allocation16_spill] sm:$0xff] }
  0x41   : > { %v744_v34 = vadd.f32 %v743_v24, %v742_v44  ;;  %v501_v26 = vrot.slane %v330_v29, %v2950_v36  ;;  %v494_v8 = vcombine.high %v330_v29, %v330_v29  ;;  %v3165_v43 = vsub.s32 0, %v3901_v39 }
  0x42   : > { %540 = vmatpush1.xpose.msra.mxu0 %v3036_v10  ;;  %610 = vmatpush1.xpose.msra.mxu1 %v3043_v37  ;;  %v787_v15 = vadd.f32 %v786_v14, %v785_v9  ;;  %v737_v19 = vadd.f32 %v736_v50, %v677_v42  ;;  %v3898_v37 = vld [vmem:[#allocation18_spill] sm:$0xff] }
  0x43   : > { %779 = vadd.xlane.f32.xlu1 %v778_v23  ;;  %541 = vmatprep.subr.mxu0 %v2998_v47  ;;  %v746_v54 = vadd.f32 %v745_v33, %v744_v34  ;;  %v509_v53 = vcombine.high %v501_v26, %v501_v26  ;;  %v508_v41 = vrot.slane %v494_v8, %v2950_v36  ;;  %v3896_v36 = vld [vmem:[#allocation14_spill] sm:$0xff] }
  0x44   : > { %611 = vmatprep.subr.mxu1 %v3003_v2  ;;  %734 = vadd.xlane.f32.xlu0 %v733_v12  ;;  %v738_v27 = vadd.f32 %v737_v19, %v678_v4  ;;  %v3895_v2 = vld [vmem:[#allocation13_spill] sm:$0xff] }
  0x45   : > { %579 = vmatprep.mubr.f32.mxu0 %v509_v53  ;;  %v510_v10 = vcombine.high %v508_v41, %v508_v41  ;;  %v748_v47 = vadd.f32 %v747_v28, %v746_v54 }
  0x46   : > { %542 = vmatpush1.xpose.msra.mxu0 %v2991_v25  ;;  %612 = vmatpush1.xpose.msra.mxu1 %v3001_v1  ;;  %v3899_v25 = vld [vmem:[#allocation15_spill] sm:$0xff]  ;;  %v3900_v1 = vld [vmem:[#allocation17_spill] sm:$0xff] }
  0x47   : > { %788 = vadd.xlane.f32.xlu1 %v787_v15  ;;  %543 = vmatprep.subr.mxu0 %v2927_v0  ;;  %v2749_v0 = vmov 0  }
  0x48   : > { %613 = vmatprep.subr.mxu1 %v2931_v13  ;;  %739 = vadd.xlane.f32.xlu0 %v738_v27 }
  0x49   : > { %649 = vmatprep.mubr.f32.mxu1 %v510_v10  ;;  %2590 = vset.pattern.permute.xlu0 %v2749_v0 }
  0x4a   : > { %544 = vmatpush1.xpose.msra.mxu0 %v3895_v2  ;;  %614 = vmatpush1.xpose.msra.mxu1 %v3896_v36 }
  0x4b   : > { %749 = vadd.xlane.f32.xlu1 %v748_v47  ;;  %545 = vmatprep.subr.mxu0 %v3897_v21 }
  0x4c   : > { %615 = vmatprep.subr.mxu1 %v3898_v37  ;;  %2591 = vset.pattern.permute.xlu1 %v2749_v0 }
  0x4e   : > { %546 = vmatpush1.xpose.msra.mxu0 %v3899_v25  ;;  %616 = vmatpush1.xpose.msra.mxu1 %v3900_v1 }
  0x51   : > { %580 = vmatmul.mubr.f32.vlgmr.msra.gmra.mxu0 %v501_v26  ;;  %650 = vmatmul.mubr.f32.vlgmr.msra.gmra.mxu1 %v508_v41 }
  0xb5   : > { %v715_v13 = vpop.xlane.xlu0 %714 }
  0xb6   : > { %v3131_v46 = vpop.xlane.xlu1 %759  ;;  %2594 = vrsqrt.f32 %v715_v13  ;;  %vm792_vm3 = vcmp.eq.f32.partialorder %v715_v13, inf  ;;  %v795_v52 = vand.u32 2147483648, %v715_v13  ;;  %vm794_vm4 = vcmp.eq.f32.partialorder %v715_v13, 0.0 }
  0xb7   : > { %2596 = vrsqrt.f32 %v3131_v46  ;;  %vm848_vm5 = vcmp.eq.f32.partialorder %v3131_v46, inf  ;;  %vm850_vm6 = vcmp.eq.f32.partialorder %v3131_v46, 0.0  ;;  %v851_v59 = vand.u32 2147483648, %v3131_v46 }
  0xbd   : > { %v3133_v55 = vpop.xlane.xlu0 %754 }
  0xbe   : > { %2598 = vrsqrt.f32 %v3133_v55  ;;  %vm841_vm7 = vcmp.eq.f32.partialorder %v3133_v55, inf  ;;  %vm843_vm8 = vcmp.eq.f32.partialorder %v3133_v55, 0.0  ;;  %v844_v30 = vand.u32 2147483648, %v3133_v55 }
  0xc0   : > { %v3135_v6 = vpop.xlane.xlu1 %764 }
  0xc1   : > { %v3137_v7 = vpop.xlane.xlu0 %719  ;;  %2600 = vrsqrt.f32 %v3135_v6  ;;  %vm855_vm9 = vcmp.eq.f32.partialorder %v3135_v6, inf  ;;  %vm857_vm10 = vcmp.eq.f32.partialorder %v3135_v6, 0.0  ;;  %v858_v32 = vand.u32 2147483648, %v3135_v6 }
  0xc2   : > { %2602 = vrsqrt.f32 %v3137_v7  ;;  %vm799_vm11 = vcmp.eq.f32.partialorder %v3137_v7, inf  ;;  %vm801_vm12 = vcmp.eq.f32.partialorder %v3137_v7, 0.0  ;;  %v802_v38 = vand.u32 2147483648, %v3137_v7 }
  0xc3   : > { %v2595_v45 = vpop.eup %2594 }
  0xc4   : > { %v3139_v3 = vpop.xlane.xlu1 %769  ;;  %v791_v35 = vmul.f32 %v2595_v45, %v715_v13  ;;  %v2597_v31 = vpop.eup %2596 }
  0xc5   : > { %v3141_v11 = vpop.xlane.xlu0 %724  ;;  %v847_v62 = vmul.f32 %v2597_v31, %v3131_v46  ;;  %vm862_vm13 = vcmp.eq.f32.partialorder %v3139_v3, inf  ;;  %vm864_vm14 = vcmp.eq.f32.partialorder %v3139_v3, 0.0  ;;  %v865_v34 = vand.u32 2147483648, %v3139_v3 }
  0xc6   : > { %2604 = vrsqrt.f32 %v3141_v11  ;;  %v793_v17 = vsel %vm792_vm3, %v715_v13, %v791_v35  ;;  %vm806_vm15 = vcmp.eq.f32.partialorder %v3141_v11, inf  ;;  %vm808_vm0 = vcmp.eq.f32.partialorder %v3141_v11, 0.0 }
  0xc7   : > { %v796_v40 = vsel %vm794_vm4, %v795_v52, %v793_v17  ;;  %v849_v33 = vsel %vm848_vm5, %v3131_v46, %v847_v62  ;;  %v809_v26 = vand.u32 2147483648, %v3141_v11 }
  0xc8   : > { %v3143_v24 = vpop.xlane.xlu1 %774  ;;  %v888_v63 = vmax.f32 %v796_v40, 1e-08  ;;  %v852_v14 = vsel %vm850_vm6, %v851_v59, %v849_v33 }
  0xc9   : > { %v3146_v61 = vpop.xlane.xlu0 %729  ;;  %vm869_vm1 = vcmp.eq.f32.partialorder %v3143_v24, inf  ;;  %v896_v54 = vmax.f32 %v852_v14, 1e-08  ;;  %vm871_vm4 = vcmp.eq.f32.partialorder %v3143_v24, 0.0  ;;  %v872_v47 = vand.u32 2147483648, %v3143_v24 }
  0xca   : > { %2606 = vrsqrt.f32 %v3146_v61  ;;  %v1051_v22 = vrot.slane %v888_v63, %v3165_v43  ;;  %vm813_vm3 = vcmp.eq.f32.partialorder %v3146_v61, inf  ;;  %vm815_vm5 = vcmp.eq.f32.partialorder %v3146_v61, 0.0 }
  0xcb   : > { %2608 = vrsqrt.f32 %v3139_v3  ;;  %v2599_v51 = vpop.eup %2598  ;;  %v816_v21 = vand.u32 2147483648, %v3146_v61 }
  0xcc   : > { %v3151_v49 = vpop.xlane.xlu1 %779  ;;  %v840_v60 = vmul.f32 %v2599_v51, %v3133_v55 }
  0xcd   : > { %v3154_v58 = vpop.xlane.xlu0 %734  ;;  %vm876_vm6 = vcmp.eq.f32.partialorder %v3151_v49, inf  ;;  %v879_v40 = vand.u32 2147483648, %v3151_v49 }
  0xce   : > { %2610 = vrsqrt.f32 %v3154_v58  ;;  %v2601_v57 = vpop.eup %2600  ;;  %v842_v29 = vsel %vm841_vm7, %v3133_v55, %v840_v60  ;;  %vm878_vm7 = vcmp.eq.f32.partialorder %v3151_v49, 0.0 }
  0xcf   : > { %2612 = vrsqrt.f32 %v3143_v24  ;;  %v2603_v16 = vpop.eup %2602  ;;  %v854_v18 = vmul.f32 %v2601_v57, %v3135_v6  ;;  %v3202_v12 = vsel %vm843_vm8, %v844_v30, %v842_v29  ;;  %vm820_vm8 = vcmp.eq.f32.partialorder %v3154_v58, inf }
  0xd0   : > { %v3157_v48 = vpop.xlane.xlu1 %788  ;;  %v798_v20 = vmul.f32 %v2603_v16, %v3137_v7  ;;  %v895_v10 = vmax.f32 %v3202_v12, 1e-08 }
  0xd1   : > { %v3161_v56 = vpop.xlane.xlu0 %739  ;;  %v856_v4 = vsel %vm855_vm9, %v3135_v6, %v854_v18  ;;  %vm822_vm9 = vcmp.eq.f32.partialorder %v3154_v58, 0.0 }
  0xd2   : > { %2614 = vrsqrt.f32 %v3161_v56  ;;  %v800_v50 = vsel %vm799_vm11, %v3137_v7, %v798_v20  ;;  %v859_v15 = vsel %vm857_vm10, %v858_v32, %v856_v4  ;;  %v823_v7 = vand.u32 2147483648, %v3154_v58 }
  0xd3   : > { %2616 = vrsqrt.f32 %v3151_v49  ;;  %v2605_v5 = vpop.eup %2604  ;;  %v803_v53 = vsel %vm801_vm12, %v802_v38, %v800_v50  ;;  %v897_v36 = vmax.f32 %v859_v15, 1e-08  ;;  %vm827_vm10 = vcmp.eq.f32.partialorder %v3161_v56, inf }
  0xd4   : > { %v3168_v44 = vpop.xlane.xlu1 %749  ;;  %v805_v23 = vmul.f32 %v2605_v5, %v3141_v11  ;;  %v889_v25 = vmax.f32 %v803_v53, 1e-08  ;;  %vm829_vm11 = vcmp.eq.f32.partialorder %v3161_v56, 0.0 }
  0xd5   : > { %2618 = vrsqrt.f32 %v3168_v44  ;;  %vm834_vm12 = vcmp.eq.f32.partialorder %v3168_v44, inf  ;;  %v837_v20 = vand.u32 2147483648, %v3168_v44 }
  0xd6   : > { %2620 = vrsqrt.f32 %v3157_v48  ;;  %v807_v27 = vsel %vm806_vm15, %v3141_v11, %v805_v23  ;;  %vm885_vm15 = vcmp.eq.f32.partialorder %v3157_v48, 0.0 }
  0xd7   : > { %v2607_v42 = vpop.eup %2606  ;;  %2622 = vrcp.f32 %v1051_v22  ;;  %v810_v1 = vsel %vm808_vm0, %v809_v26, %v807_v27  ;;  %v3902_v26 = vld [vmem:[#allocation10_spill] sm:$0xff]  ;;  %vm961_vm0 = vcmask 130112  }
  0xd8   : > { %v2609_v9 = vpop.eup %2608  ;;  %v812_v19 = vmul.f32 %v2607_v42, %v3146_v61  ;;  %2624 = vrcp.f32 %v888_v63  ;;  %v890_v45 = vmax.f32 %v810_v1, 1e-08  ;;  %v984_v12 = vadd.s32 4294967256, %v3902_v26 }
  0xd9   : > { %v861_v41 = vmul.f32 %v2609_v9, %v3139_v3  ;;  %2626 = vrcp.f32 %v896_v54 }
  0xda   : > { %v814_v0 = vsel %vm813_vm3, %v3146_v61, %v812_v19  ;;  %2628 = vrcp.f32 %v895_v10  ;;  %v830_v61 = vand.u32 2147483648, %v3161_v56  ;;  %vm975_vm3 = vcmask 261312  }
  0xdb   : > { %v2611_v8 = vpop.eup %2610  ;;  %v863_v46 = vsel %vm862_vm13, %v3139_v3, %v861_v41  ;;  %2630 = vrcp.f32 %v897_v36  ;;  %v817_v35 = vsel %vm815_vm5, %v816_v21, %v814_v0  ;;  %vm883_vm13 = vcmp.eq.f32.partialorder %v3157_v48, inf }
  0xdc   : > { %v2613_v28 = vpop.eup %2612  ;;  %v819_v37 = vmul.f32 %v2611_v8, %v3154_v58  ;;  %2632 = vrcp.f32 %v889_v25  ;;  %v866_v31 = vsel %vm864_vm14, %v865_v34, %v863_v46  ;;  %v891_v62 = vmax.f32 %v817_v35, 1e-08 }
  0xdd   : > { %v868_v55 = vmul.f32 %v2613_v28, %v3143_v24  ;;  %v898_v60 = vmax.f32 %v866_v31, 1e-08  ;;  %2634 = vrcp.f32 %v890_v45  ;;  %vm836_vm14 = vcmp.eq.f32.partialorder %v3168_v44, 0.0 }
  0xde   : > { %v821_v52 = vsel %vm820_vm8, %v3154_v58, %v819_v37  ;;  %2636 = vrcp.f32 %v891_v62  ;;  %v956_v8 = vadd.s32 4294967288, %v3902_v26  ;;  %v963_v41 = vadd.s32 4294967280, %v3902_v26 }
  0xdf   : > { %v2615_v2 = vpop.eup %2614  ;;  %v870_v57 = vsel %vm869_vm1, %v3143_v24, %v868_v55  ;;  %v824_v63 = vsel %vm822_vm9, %v823_v7, %v821_v52  ;;  %v886_v24 = vand.u32 2147483648, %v3157_v48  ;;  %2638 = vrcp.f32 %v898_v60 }
  0xe0   : > { %v2617_v13 = vpop.eup %2616  ;;  %v826_v11 = vmul.f32 %v2615_v2, %v3161_v56  ;;  %v873_v30 = vsel %vm871_vm4, %v872_v47, %v870_v57  ;;  %v892_v29 = vmax.f32 %v824_v63, 1e-08  ;;  %v959_v28 = vsub.s32 %v956_v8, %v3901_v39 }
  0xe1   : > { %v875_v51 = vmul.f32 %v2617_v13, %v3151_v49  ;;  %v899_v14 = vmax.f32 %v873_v30, 1e-08  ;;  %v970_v36 = vadd.s32 4294967272, %v3902_v26  ;;  %v966_v21 = vsub.s32 %v963_v41, %v3901_v39 }
  0xe2   : > { %v2619_v6 = vpop.eup %2618  ;;  %v828_v3 = vsel %vm827_vm10, %v3161_v56, %v826_v11  ;;  %2640 = vrcp.f32 %v892_v29  ;;  %v1055_v25 = vrot.slane %v895_v10, %v3165_v43  ;;  %v977_v13 = vadd.s32 4294967264, %v3902_v26 }
  0xe3   : > { %v2621_v17 = vpop.eup %2620  ;;  %v833_v16 = vmul.f32 %v2619_v6, %v3168_v44  ;;  %v877_v58 = vsel %vm876_vm6, %v3151_v49, %v875_v51  ;;  %v831_v32 = vsel %vm829_vm11, %v830_v61, %v828_v3  ;;  %2642 = vrcp.f32 %v899_v14 }
  0xe4   : > { %v2623_v59 = vpop.eup %2622  ;;  %v882_v18 = vmul.f32 %v2621_v17, %v3157_v48  ;;  %v880_v50 = vsel %vm878_vm7, %v879_v40, %v877_v58  ;;  %v973_v46 = vsub.s32 %v970_v36, %v3901_v39  ;;  %vm968_vm1 = vcmask 195712  }
  0xe5   : > { %v835_v38 = vsel %vm834_vm12, %v3168_v44, %v833_v16  ;;  %v2625_v9 = vpop.eup %2624  ;;  %v893_v44 = vmax.f32 %v831_v32, 1e-08  ;;  %v900_v19 = vmax.f32 %v880_v50, 1e-08  ;;  %v980_v35 = vsub.s32 %v977_v13, %v3901_v39 }
  0xe6   : > { %v884_v56 = vsel %vm883_vm13, %v3157_v48, %v882_v18  ;;  %v838_v34 = vsel %vm836_vm14, %v837_v20, %v835_v38  ;;  %v2627_v15 = vpop.eup %2626  ;;  %v3285_v48 = vsub.s32 %v3902_v26, %v3901_v39  ;;  %v991_v57 = vadd.s32 4294967248, %v3902_v26 }
  0xe7   : > { %v887_v54 = vsel %vm885_vm15, %v886_v24, %v884_v56  ;;  %v2629_v53 = vpop.eup %2628  ;;  %v894_v49 = vmax.f32 %v838_v34, 1e-08  ;;  %2644 = vrcp.f32 %v893_v44  ;;  %v1005_v6 = vrot.slane %v2627_v15, %v959_v28 }
  0xe8   : > { %v2631_v27 = vpop.eup %2630  ;;  %v901_v2 = vmax.f32 %v887_v54, 1e-08  ;;  %2646 = vrcp.f32 %v900_v19  ;;  %v955_v1 = vrot.slane %v2625_v9, %v3285_v48  ;;  %v1001_v55 = vrot.slane %v2629_v53, %v3285_v48 }
  0xe9   : > { %v2633_v47 = vpop.eup %2632  ;;  %2648 = vrcp.f32 %v894_v49  ;;  %v1010_v52 = vrot.slane %v2631_v27, %v966_v21  ;;  %v987_v16 = vsub.s32 %v984_v12, %v3901_v39  ;;  %vm982_vm4 = vcmask 326912  }
  0xea   : > { %v2635_v37 = vpop.eup %2634  ;;  %v960_v0 = vrot.slane %v2633_v47, %v959_v28  ;;  %2650 = vrcp.f32 %v901_v2  ;;  %v1006_v51 = vsel %vm961_vm0, %v1005_v6, %v1001_v55  ;;  %vm989_vm5 = vcmask 392512   ;;  %v3903_v28 = vld [vmem:[#allocation11_spill] sm:$0xff] }
  0xeb   : > { %v2637_v7 = vpop.eup %2636  ;;  %v967_v11 = vrot.slane %v2635_v37, %v966_v21  ;;  %2652 = vrcp.f32 %v1055_v25  ;;  %vm996_vm6 = vcmask 458112   ;;  %vm1041_vm7 = vcmask 1042434  }
  0xec   : > { %v962_v45 = vsel %vm961_vm0, %v960_v0, %v955_v1  ;;  %v2639_v10 = vpop.eup %2638  ;;  %v974_v31 = vrot.slane %v2637_v7, %v973_v46  ;;  %vm1046_vm8 = vcmask 403457   ;;  %vm1077_vm9 = vcmask 1041409   ;;  %v1060_v1 = vld [vmem:[#allocation3] sm:$0x3] }
  0xed   : > { %v969_v40 = vsel %vm968_vm1, %v967_v11, %v962_v45  ;;  %v1015_v62 = vrot.slane %v2639_v10, %v973_v46  ;;  %vm1081_vm10 = vcmask 9216  }
  0xee   : > { %v976_v60 = vsel %vm975_vm3, %v974_v31, %v969_v40 }
  0xef   : > { %v2641_v17 = vpop.eup %2640 }
  0xf0   : > { %v2643_v61 = vpop.eup %2642  ;;  %v981_v3 = vrot.slane %v2641_v17, %v980_v35 }
  0xf2   : > { %v983_v29 = vsel %vm982_vm4, %v981_v3, %v976_v60 }
  0xf4   : > { %v2645_v63 = vpop.eup %2644 }
  0xf5   : > { %v419_v5 = vpop.f32.mrf.mxu0  ;;  %v489_v22 = vpop.f32.mrf.mxu1  ;;  %v988_v58 = vrot.slane %v2645_v63, %v987_v16 }
  0xf6   : > { %v3267_v33 = vadd.f32 %v489_v22, %v419_v5  ;;  %v2647_v18 = vpop.eup %2646  ;;  %v994_v5 = vsub.s32 %v991_v57, %v3901_v39  ;;  %v1020_v22 = vrot.slane %v2643_v61, %v980_v35 }
  0xf7   : > { %v421_v42 = vpop.f32.mrf.mxu0  ;;  %v491_v4 = vpop.f32.mrf.mxu1  ;;  %v990_v14 = vsel %vm989_vm5, %v988_v58, %v983_v29 }
  0xf8   : > { %v1057_v23 = vmul.f32 %v2623_v59, %v3267_v33  ;;  %v1011_v59 = vsel %vm968_vm1, %v1010_v52, %v1006_v51  ;;  %v2649_v30 = vpop.eup %2648  ;;  %v932_v38 = vrot.slane %v3267_v33, 7  ;;  %v1025_v42 = vrot.slane %v2647_v18, %v987_v16 }
  0xf9   : > { %v1016_v20 = vsel %vm975_vm3, %v1015_v62, %v1011_v59  ;;  %v2651_v32 = vpop.eup %2650  ;;  %v995_v4 = vrot.slane %v2649_v30, %v994_v5 }
  0xfa   : > { %1064 = vperm.xlu0 %2590, %v1057_v23   ;;  %v1021_v9 = vsel %vm982_vm4, %v1020_v22, %v1016_v20  ;;  %v2653_v39 = vpop.eup %2652  ;;  %v1030_v56 = vrot.slane %v2651_v32, %v994_v5  ;;  %v936_v26 = vsub.f32 %v3267_v33, %v932_v38 }
  0xfb   : > { %v1026_v15 = vsel %vm989_vm5, %v1025_v42, %v1021_v9  ;;  %v997_v54 = vsel %vm996_vm6, %v995_v4, %v990_v14 }
  0xfc   : > { %v1031_v49 = vsel %vm996_vm6, %v1030_v56, %v1026_v15  ;;  %v1034_v41 = vmul.f32 %v997_v54, %v936_v26 }
  0xfe   : > { %v1036_v2 = vmul.f32 %v3903_v28, %v1034_v41 }
 0x111   : > { %v581_v24 = vpop.f32.mrf.mxu0  ;;  %v651_v23 = vpop.f32.mrf.mxu1 }
 0x112   : > { %v652_v50 = vadd.f32 %v651_v23, %v581_v24 }
 0x113   : > { %v583_v44 = vpop.f32.mrf.mxu0  ;;  %v653_v34 = vpop.f32.mrf.mxu1 }
 0x114   : > { %v933_v8 = vrot.slane %v652_v50, 7  ;;  %v1059_v19 = vmul.f32 %v2653_v39, %v652_v50 }
 0x116   : > { %v937_v53 = vsub.f32 %v652_v50, %v933_v8  ;;  %1067 = vperm.xlu1 %2591, %v1059_v19  }
 0x118   : > { %v1035_v27 = vmul.f32 %v1031_v49, %v937_v53 }
 0x11a   : > { %v1037_v47 = vmul.f32 %v3903_v28, %v1035_v27 }
 0x11c   : > { %v1040_v36 = vrot.slane %v1037_v47, 7 }
 0x11e   : > { %v1042_v21 = vsel %vm1041_vm7, %v1040_v36, %v1036_v2 }
 0x11f   : > { %1047 = vst.msk [vmem:[%s1045_s9 - $0x1] sm:$0x6] %vm1046_vm8, %v1042_v21 }
 0x175   : > { %v1065_v33 = vpop.permute.xlu0 %1064 }
 0x176   : > { %v1072_v25 = vrot.slane %v1065_v33, %v3285_v48 }
 0x191   : > { %v1068_v37 = vpop.permute.xlu1 %1067 }
 0x192   : > { %v1076_v0 = vrot.slane %v1068_v37, %v3285_v48 }
 0x193   : > { %1086 = sbr.rel (%p2472_p5) target bundleno = 1593 (0x639), region = 44 }
 0x194   : > { %v1078_v13 = vsel %vm1077_vm9, %v1076_v0, %v1072_v25 }
 0x195   : > { %v1080_v46 = vadd.f32 %v1078_v13, %v1060_v1 }
 0x197   : > { %1082 = vst.msk [vmem:[#allocation3] sm:$0x3] %vm1081_vm10, %v1080_v46 }
 0x198   : > { %v3317_v55 = vld [vmem:[#allocation2 + $0x4] sm:$0x3]  ;;  %vm1102_vm11 = vcmask 402432   ;;  %v3319_v6 = vld [vmem:[#allocation2] sm:$0x3]  ;;  %vm1413_vm12 = vcmask 1046528  }
 0x199   : > { %v1109_v7 = vsel %vm1102_vm11, %v3317_v55, 0.0  ;;  %v1103_v11 = vsel %vm1102_vm11, %v3319_v6, 0.0  ;;  %v3325_v48 = vld [vmem:[#allocation2 + $0x6] sm:$0x3]  ;;  %v3327_v45 = vld [vmem:[#allocation2 + $0x2] sm:$0x3] }
 0x19a   : > { %1110 = vadd.xlane.f32.xlu1 %v1109_v7  ;;  %1104 = vadd.xlane.f32.xlu0 %v1103_v11  ;;  %v1112_v12 = vsel %vm1102_vm11, %v3325_v48, 0.0  ;;  %v1106_v10 = vsel %vm1102_vm11, %v3327_v45, 0.0  ;;  %v3333_v35 = vld [vmem:[#allocation2 + $0xa] sm:$0x3]  ;;  %v3335_v52 = vld [vmem:[#allocation2 + $0x8] sm:$0x3] }
 0x19b   : > { %v1118_v17 = vsel %vm1102_vm11, %v3333_v35, 0.0  ;;  %v1115_v31 = vsel %vm1102_vm11, %v3335_v52, 0.0  ;;  %v3341_v51 = vld [vmem:[#allocation2 + $0xe] sm:$0x3]  ;;  %v3343_v40 = vld [vmem:[#allocation2 + $0xc] sm:$0x3] }
 0x19c   : > { %v1124_v57 = vsel %vm1102_vm11, %v3341_v51, 0.0  ;;  %v1121_v61 = vsel %vm1102_vm11, %v3343_v40, 0.0  ;;  %v3349_v16 = vld [vmem:[#allocation2 + $0x12] sm:$0x3]  ;;  %v3351_v62 = vld [vmem:[#allocation2 + $0x10] sm:$0x3] }
 0x19d   : > { %v1130_v63 = vsel %vm1102_vm11, %v3349_v16, 0.0  ;;  %v1127_v3 = vsel %vm1102_vm11, %v3351_v62, 0.0  ;;  %v3357_v59 = vld [vmem:[#allocation2 + $0x16] sm:$0x3]  ;;  %v3359_v60 = vld [vmem:[#allocation2 + $0x14] sm:$0x3] }
 0x19e   : > { %1113 = vadd.xlane.f32.xlu1 %v1112_v12  ;;  %1107 = vadd.xlane.f32.xlu0 %v1106_v10  ;;  %v1136_v18 = vsel %vm1102_vm11, %v3357_v59, 0.0  ;;  %v1133_v5 = vsel %vm1102_vm11, %v3359_v60, 0.0  ;;  %vm1352_vm13 = vcmask 49152   ;;  %vm1409_vm14 = vcmask 56320  }
 0x19f   : > { %vm2274_vm15 = vcmask 785408  }
 0x1a2   : > { %1119 = vadd.xlane.f32.xlu1 %v1118_v17  ;;  %1116 = vadd.xlane.f32.xlu0 %v1115_v31 }
 0x1a6   : > { %1125 = vadd.xlane.f32.xlu1 %v1124_v57  ;;  %1122 = vadd.xlane.f32.xlu0 %v1121_v61 }
 0x1aa   : > { %1131 = vadd.xlane.f32.xlu1 %v1130_v63  ;;  %1128 = vadd.xlane.f32.xlu0 %v1127_v3 }
 0x1ae   : > { %1137 = vadd.xlane.f32.xlu1 %v1136_v18  ;;  %1134 = vadd.xlane.f32.xlu0 %v1133_v5 }
 0x223   : > { %v1111_v22 = vpop.xlane.xlu1 %1110  ;;  %v1105_v30 = vpop.xlane.xlu0 %1104 }
 0x224   : > { %v1139_v23 = vmul.f32 0.020408163, %v1105_v30  ;;  %v1141_v39 = vmul.f32 0.020408163, %v1111_v22 }
 0x226   : > { %v1151_v54 = vsel %vm741_vm2, %v1139_v23, -inf  ;;  %v1153_v33 = vsel %vm741_vm2, %v1141_v39, -inf }
 0x227   : > { %v1114_v58 = vpop.xlane.xlu1 %1113  ;;  %v1108_v20 = vpop.xlane.xlu0 %1107 }
 0x228   : > { %v1140_v9 = vmul.f32 0.020408163, %v1108_v20  ;;  %v1142_v56 = vmul.f32 0.020408163, %v1114_v58 }
 0x22a   : > { %v1152_v53 = vsel %vm741_vm2, %v1140_v9, -inf  ;;  %v1154_v37 = vsel %vm741_vm2, %v1142_v56, -inf }
 0x22b   : > { %v1120_v29 = vpop.xlane.xlu1 %1119  ;;  %v1117_v32 = vpop.xlane.xlu0 %1116 }
 0x22c   : > { %v1144_v4 = vmul.f32 0.020408163, %v1120_v29  ;;  %v1143_v24 = vmul.f32 0.020408163, %v1117_v32 }
 0x22e   : > { %v1157_v26 = vsel %vm741_vm2, %v1144_v4, -inf  ;;  %v1155_v8 = vsel %vm741_vm2, %v1143_v24, -inf }
 0x22f   : > { %v1126_v38 = vpop.xlane.xlu1 %1125  ;;  %v1123_v42 = vpop.xlane.xlu0 %1122  ;;  %v1158_v47 = vmax.f32 %v1152_v53, %v1157_v26  ;;  %v1156_v2 = vmax.f32 %v1151_v54, %v1155_v8 }
 0x230   : > { %v1146_v14 = vmul.f32 0.020408163, %v1126_v38  ;;  %v1145_v50 = vmul.f32 0.020408163, %v1123_v42 }
 0x232   : > { %v1161_v49 = vsel %vm741_vm2, %v1146_v14, -inf  ;;  %v1159_v41 = vsel %vm741_vm2, %v1145_v50, -inf }
 0x233   : > { %v1132_v44 = vpop.xlane.xlu1 %1131  ;;  %v1129_v34 = vpop.xlane.xlu0 %1128  ;;  %v1162_v0 = vmax.f32 %v1154_v37, %v1161_v49  ;;  %v1160_v13 = vmax.f32 %v1153_v33, %v1159_v41 }
 0x234   : > { %v1148_v15 = vmul.f32 0.020408163, %v1132_v44  ;;  %v1147_v19 = vmul.f32 0.020408163, %v1129_v34 }
 0x236   : > { %v1165_v27 = vsel %vm741_vm2, %v1148_v15, -inf  ;;  %v1163_v28 = vsel %vm741_vm2, %v1147_v19, -inf }
 0x237   : > { %v1138_v36 = vpop.xlane.xlu1 %1137  ;;  %v1135_v21 = vpop.xlane.xlu0 %1134  ;;  %v1166_v46 = vmax.f32 %v1158_v47, %v1165_v27  ;;  %v1164_v7 = vmax.f32 %v1156_v2, %v1163_v28 }
 0x238   : > { %v1150_v25 = vmul.f32 0.020408163, %v1138_v36  ;;  %v1149_v1 = vmul.f32 0.020408163, %v1135_v21 }
 0x239   : > { %v1171_v31 = vmax.f32 %v1164_v7, %v1166_v46 }
 0x23a   : > { %v1169_v11 = vsel %vm741_vm2, %v1150_v25, -inf  ;;  %v1167_v12 = vsel %vm741_vm2, %v1149_v1, -inf }
 0x23b   : > { %v1170_v10 = vmax.f32 %v1162_v0, %v1169_v11  ;;  %v1168_v17 = vmax.f32 %v1160_v13, %v1167_v12 }
 0x23d   : > { %v1172_v57 = vmax.f32 %v1168_v17, %v1170_v10 }
 0x23f   : > { %v1173_v61 = vmax.f32 %v1171_v31, %v1172_v57 }
 0x241   : > { %v1174_v63 = vsub.f32 %v1139_v23, %v1173_v61  ;;  %v1175_v3 = vsub.f32 %v1140_v9, %v1173_v61  ;;  %v1176_v18 = vsub.f32 %v1141_v39, %v1173_v61  ;;  %v1177_v5 = vsub.f32 %v1142_v56, %v1173_v61 }
 0x242   : > { %v1178_v22 = vsub.f32 %v1143_v24, %v1173_v61  ;;  %v1179_v29 = vsub.f32 %v1144_v4, %v1173_v61  ;;  %v1180_v38 = vsub.f32 %v1145_v50, %v1173_v61  ;;  %v1181_v44 = vsub.f32 %v1146_v14, %v1173_v61 }
 0x243   : > { %v1186_v30 = vmul.f32 1.442695, %v1174_v63  ;;  %v1188_v58 = vmul.f32 1.442695, %v1175_v3  ;;  %v1190_v20 = vmul.f32 1.442695, %v1176_v18  ;;  %v1182_v26 = vsub.f32 %v1147_v19, %v1173_v61 }
 0x244   : > { %v1192_v32 = vmul.f32 1.442695, %v1177_v5  ;;  %v1194_v42 = vmul.f32 1.442695, %v1178_v22  ;;  %v1196_v34 = vmul.f32 1.442695, %v1179_v29  ;;  %v1183_v9 = vsub.f32 %v1148_v15, %v1173_v61 }
 0x245   : > { %2654 = vpow2.f32 %v1186_v30  ;;  %v1198_v23 = vmul.f32 1.442695, %v1180_v38  ;;  %v1200_v39 = vmul.f32 1.442695, %v1181_v44  ;;  %v1184_v24 = vsub.f32 %v1149_v1, %v1173_v61 }
 0x246   : > { %2656 = vpow2.f32 %v1188_v58  ;;  %v1202_v56 = vmul.f32 1.442695, %v1182_v26  ;;  %v1185_v8 = vsub.f32 %v1150_v25, %v1173_v61  ;;  %v1204_v4 = vmul.f32 1.442695, %v1183_v9 }
 0x247   : > { %2658 = vpow2.f32 %v1190_v20  ;;  %v1206_v50 = vmul.f32 1.442695, %v1184_v24 }
 0x248   : > { %2660 = vpow2.f32 %v1192_v32  ;;  %v1208_v19 = vmul.f32 1.442695, %v1185_v8 }
 0x249   : > { %2662 = vpow2.f32 %v1194_v42 }
 0x24a   : > { %2664 = vpow2.f32 %v1196_v34 }
 0x24b   : > { %2666 = vpow2.f32 %v1198_v23 }
 0x24c   : > { %2668 = vpow2.f32 %v1200_v39 }
 0x24d   : > { %2670 = vpow2.f32 %v1202_v56 }
 0x24e   : > { %2672 = vpow2.f32 %v1204_v4 }
 0x24f   : > { %2674 = vpow2.f32 %v1206_v50 }
 0x250   : > { %2676 = vpow2.f32 %v1208_v19 }
 0x252   : > { %v2655_v54 = vpop.eup %2654 }
 0x253   : > { %v2657_v53 = vpop.eup %2656  ;;  %v1210_v14 = vsel %vm741_vm2, %v2655_v54, 0.0 }
 0x254   : > { %v2659_v49 = vpop.eup %2658  ;;  %v1211_v41 = vsel %vm741_vm2, %v2657_v53, 0.0 }
 0x255   : > { %v2661_v15 = vpop.eup %2660  ;;  %v1212_v27 = vadd.f32 %v1211_v41, %v1210_v14  ;;  %v1213_v28 = vsel %vm741_vm2, %v2659_v49, 0.0 }
 0x256   : > { %v2663_v47 = vpop.eup %2662  ;;  %v1215_v36 = vsel %vm741_vm2, %v2661_v15, 0.0 }
 0x257   : > { %v1214_v2 = vadd.f32 %v1213_v28, %v1212_v27  ;;  %v2665_v21 = vpop.eup %2664  ;;  %v1217_v37 = vsel %vm741_vm2, %v2663_v47, 0.0 }
 0x258   : > { %v2667_v25 = vpop.eup %2666  ;;  %v1219_v0 = vsel %vm741_vm2, %v2665_v21, 0.0 }
 0x259   : > { %v1216_v33 = vadd.f32 %v1215_v36, %v1214_v2  ;;  %v2669_v13 = vpop.eup %2668  ;;  %v1221_v7 = vsel %vm741_vm2, %v2667_v25, 0.0 }
 0x25a   : > { %v2671_v11 = vpop.eup %2670  ;;  %v1223_v10 = vsel %vm741_vm2, %v2669_v13, 0.0 }
 0x25b   : > { %v1218_v1 = vadd.f32 %v1217_v37, %v1216_v33  ;;  %v2673_v17 = vpop.eup %2672  ;;  %v1225_v57 = vsel %vm741_vm2, %v2671_v11, 0.0 }
 0x25c   : > { %v2675_v61 = vpop.eup %2674  ;;  %v1227_v3 = vsel %vm741_vm2, %v2673_v17, 0.0 }
 0x25d   : > { %v1220_v46 = vadd.f32 %v1219_v0, %v1218_v1  ;;  %v2677_v18 = vpop.eup %2676  ;;  %v1229_v22 = vsel %vm741_vm2, %v2675_v61, 0.0 }
 0x25e   : > { %v1231_v58 = vsel %vm741_vm2, %v2677_v18, 0.0 }
 0x25f   : > { %v1222_v12 = vadd.f32 %v1221_v7, %v1220_v46 }
 0x261   : > { %v1224_v31 = vadd.f32 %v1223_v10, %v1222_v12  ;;  %v3904_v10 = vld [vmem:[#allocation11_spill] sm:$0xff] }
 0x262   : > { %vm1281_vm2 = vcmp.gt.f32.partialorder %v3904_v10, 0.5 }
 0x263   : > { %v1226_v63 = vadd.f32 %v1225_v57, %v1224_v31 }
 0x265   : > { %v1228_v5 = vadd.f32 %v1227_v3, %v1226_v63 }
 0x267   : > { %v1230_v30 = vadd.f32 %v1229_v22, %v1228_v5 }
 0x269   : > { %v1232_v20 = vadd.f32 %v1231_v58, %v1230_v30 }
 0x26b   : > { %2678 = vrcp.f32 %v1232_v20 }
 0x278   : > { %v2679_v29 = vpop.eup %2678 }
 0x279   : > { %v1234_v32 = vmul.f32 %v2679_v29, %v2655_v54  ;;  %v1235_v38 = vmul.f32 %v2679_v29, %v2657_v53  ;;  %v1236_v42 = vmul.f32 %v2679_v29, %v2659_v49  ;;  %v1237_v44 = vmul.f32 %v2679_v29, %v2661_v15 }
 0x27a   : > { %v1238_v23 = vmul.f32 %v2679_v29, %v2663_v47  ;;  %v1239_v39 = vmul.f32 %v2679_v29, %v2665_v21  ;;  %v1240_v50 = vmul.f32 %v2679_v29, %v2667_v25  ;;  %v1242_v19 = vmul.f32 %v2679_v29, %v2671_v11 }
 0x27b   : > { %v1246_v34 = vmul.f32 %v1234_v32, %v3319_v6  ;;  %v1247_v26 = vmul.f32 %v1235_v38, %v3327_v45  ;;  %v1248_v9 = vmul.f32 %v1236_v42, %v3317_v55  ;;  %v1249_v24 = vmul.f32 %v1237_v44, %v3325_v48 }
 0x27c   : > { %v1250_v54 = vmul.f32 %v1238_v23, %v3335_v52  ;;  %v1241_v6 = vmul.f32 %v2679_v29, %v2669_v13  ;;  %v1251_v45 = vmul.f32 %v1239_v39, %v3333_v35  ;;  %v1252_v48 = vmul.f32 %v1240_v50, %v3343_v40 }
 0x27d   : > { %v1258_v56 = vsel %vm1102_vm11, %v1246_v34, 0.0  ;;  %v1259_v8 = vsel %vm1102_vm11, %v1247_v26, 0.0  ;;  %v1261_v53 = vsel %vm1102_vm11, %v1248_v9, 0.0  ;;  %v1263_v49 = vsel %vm1102_vm11, %v1249_v24, 0.0 }
 0x27e   : > { %v1260_v4 = vadd.f32 %v1259_v8, %v1258_v56  ;;  %v1265_v41 = vsel %vm1102_vm11, %v1250_v54, 0.0  ;;  %v1243_v27 = vmul.f32 %v2679_v29, %v2673_v17  ;;  %v1253_v28 = vmul.f32 %v1241_v6, %v3341_v51 }
 0x27f   : > { %v1267_v52 = vsel %vm1102_vm11, %v1251_v45, 0.0  ;;  %v1244_v2 = vmul.f32 %v2679_v29, %v2675_v61  ;;  %v1254_v36 = vmul.f32 %v1242_v19, %v3351_v62  ;;  %v1269_v35 = vsel %vm1102_vm11, %v1252_v48, 0.0  ;;  %v1406_v48 = vld [vmem:[%s3871_s3 + $0x8] sm:$0x7f] }
 0x280   : > { %v1262_v14 = vadd.f32 %v1261_v53, %v1260_v4  ;;  %v1245_v33 = vmul.f32 %v2679_v29, %v2677_v18  ;;  %v1255_v37 = vmul.f32 %v1243_v27, %v3349_v16  ;;  %v1271_v40 = vsel %vm1102_vm11, %v1253_v28, 0.0  ;;  %v3905_v4 = vld [vmem:[#allocation12_spill] sm:$0xff]  ;;  %2473 = vmatprep.subr.msk.mxu0 %vm1413_vm12, %v1406_v48  ;;  %v1591_v48 = vld [vmem:[%s3870_s2 + $0xa0] sm:$0xff] }
 0x281   : > { %v1256_v1 = vmul.f32 %v1244_v2, %v3359_v60  ;;  %v1273_v0 = vsel %vm1102_vm11, %v1254_v36, 0.0  ;;  %v2751_v9 = vmov 1966171168   ;;  %v1407_v27 = vld [vmem:[%s3871_s3 + $0x10] sm:$0x7f] }
 0x282   : > { %v1264_v55 = vadd.f32 %v1263_v49, %v1262_v14  ;;  %v1257_v13 = vmul.f32 %v1245_v33, %v3357_v59  ;;  %v1275_v46 = vsel %vm1102_vm11, %v1255_v37, 0.0  ;;  %v1087_v59 = vld [vmem:[#allocation3] sm:$0x3]  ;;  %v1317_v39 = vunpack.c.l.s4 %v2751_v9 }
 0x283   : > { %v1277_v62 = vsel %vm1102_vm11, %v1256_v1, 0.0  ;;  %v1088_v61 = vmul.f32 0.083333336, %v1087_v59  ;;  %v1601_v59 = vld [vmem:[%s3870_s2 + $0xf0] sm:$0xff]  ;;  %v1610_v9 = vld [vmem:[%s3870_s2 + $0x138] sm:$0xff] }
 0x284   : > { %v1266_v15 = vadd.f32 %v1265_v41, %v1264_v55  ;;  %v1279_v12 = vsel %vm1102_vm11, %v1257_v13, 0.0  ;;  %v1318_v24 = vunpack.c.0.s8 %v1317_v39  ;;  %v1405_v41 = vld [vmem:[%s3871_s3] sm:$0x7f]  ;;  %v1584_v39 = vld [vmem:[%s3870_s2 + $0x68] sm:$0xff] }
 0x285   : > { %1089 = vst.msk [vmem:[#allocation4] sm:$0x3] %vm1081_vm10, %v1088_v61  ;;  %2474 = vmatpush1.msk.msra.mxu0 %vm1413_vm12, %v1405_v41  ;;  %v1575_v61 = vld [vmem:[%s3870_s2 + $0x20] sm:$0xff]  ;;  %v1618_v41 = vld [vmem:[%s3870_s2 + $0x178] sm:$0xff] }
 0x286   : > { %v1268_v47 = vadd.f32 %v1267_v52, %v1266_v15  ;;  %v1321_v50 = vsub.s32 %v1318_v24, %v3905_v4  ;;  %v1408_v15 = vld [vmem:[%s3871_s3 + $0x18] sm:$0x7f]  ;;  %v1611_v24 = vld [vmem:[%s3870_s2 + $0x140] sm:$0xff] }
 0x287   : > { %2476 = vmatprep.subr.msk.mxu1 %vm1413_vm12, %v1408_v15  ;;  %v1586_v4 = vld [vmem:[%s3870_s2 + $0x78] sm:$0xff]  ;;  %v1592_v15 = vld [vmem:[%s3870_s2 + $0xa8] sm:$0xff] }
 0x288   : > { %v1270_v21 = vadd.f32 %v1269_v35, %v1268_v47  ;;  %2477 = vmatpush1.msk.msra.mxu1 %vm1413_vm12, %v1407_v27  ;;  %v1619_v27 = vld [vmem:[%s3870_s2 + $0x180] sm:$0xff] }
 0x28a   : > { %v1272_v25 = vadd.f32 %v1271_v40, %v1270_v21 }
 0x28c   : > { %v1274_v51 = vadd.f32 %v1273_v0, %v1272_v25 }
 0x28e   : > { %v1276_v7 = vadd.f32 %v1275_v46, %v1274_v51 }
 0x290   : > { %v1278_v11 = vadd.f32 %v1277_v62, %v1276_v7 }
 0x292   : > { %v1280_v16 = vadd.f32 %v1279_v12, %v1278_v11  ;;  %v1571_v11 = vld [vmem:[%s3870_s2] sm:$0xff]  ;;  %v1572_v12 = vld [vmem:[%s3870_s2 + $0x8] sm:$0xff] }
 0x294   : > { %v1293_v17 = vsel %vm1281_vm2, %v1280_v16, 3e+38  ;;  %v1282_v31 = vsel %vm1281_vm2, %v1280_v16, -3e+38 }
 0x295   : > { %v1294_v60 = vsel %vm1102_vm11, %v1293_v17, inf  ;;  %v1283_v57 = vsel %vm1102_vm11, %v1282_v31, -inf  ;;  %v1599_v17 = vld [vmem:[%s3870_s2 + $0xe0] sm:$0xff]  ;;  %v1573_v31 = vld [vmem:[%s3870_s2 + $0x10] sm:$0xff] }
 0x296   : > { %1295 = vmin.xlane.f32.xlu1 %v1294_v60  ;;  %1284 = vmax.xlane.f32.xlu0 %v1283_v57  ;;  %v1600_v60 = vld [vmem:[%s3870_s2 + $0xe8] sm:$0xff]  ;;  %v1574_v57 = vld [vmem:[%s3870_s2 + $0x18] sm:$0xff] }
 0x31f   : > { %v1296_v63 = vpop.xlane.xlu1 %1295  ;;  %v1285_v3 = vpop.xlane.xlu0 %1284 }
 0x320   : > { %v1297_v18 = vrot.slane %v1296_v63, 4  ;;  %v1286_v5 = vrot.slane %v1285_v3, 4 }
 0x322   : > { %v1298_v22 = vmin.f32 %v1296_v63, %v1297_v18  ;;  %v1287_v30 = vmax.f32 %v1285_v3, %v1286_v5  ;;  %v1602_v63 = vld [vmem:[%s3870_s2 + $0xf8] sm:$0xff]  ;;  %v1576_v3 = vld [vmem:[%s3870_s2 + $0x28] sm:$0xff]  ;;  %v1603_v18 = vld [vmem:[%s3870_s2 + $0x100] sm:$0xff] }
 0x323   : > { %v1577_v5 = vld [vmem:[%s3870_s2 + $0x30] sm:$0xff] }
 0x324   : > { %v1299_v58 = vrot.slane %v1298_v22, 2  ;;  %v1288_v20 = vrot.slane %v1287_v30, 2 }
 0x326   : > { %v1289_v29 = vmax.f32 %v1287_v30, %v1288_v20  ;;  %v1300_v32 = vmin.f32 %v1298_v22, %v1299_v58  ;;  %v1604_v22 = vld [vmem:[%s3870_s2 + $0x108] sm:$0xff]  ;;  %v1578_v30 = vld [vmem:[%s3870_s2 + $0x38] sm:$0xff]  ;;  %v1605_v58 = vld [vmem:[%s3870_s2 + $0x110] sm:$0xff] }
 0x327   : > { %v1579_v20 = vld [vmem:[%s3870_s2 + $0x40] sm:$0xff] }
 0x328   : > { %v1290_v38 = vrot.slane %v1289_v29, 1  ;;  %v1301_v42 = vrot.slane %v1300_v32, 1 }
 0x32a   : > { %v1291_v44 = vmax.f32 %v1289_v29, %v1290_v38  ;;  %v1302_v34 = vmin.f32 %v1300_v32, %v1301_v42  ;;  %v1606_v29 = vld [vmem:[%s3870_s2 + $0x118] sm:$0xff]  ;;  %v1580_v32 = vld [vmem:[%s3870_s2 + $0x48] sm:$0xff]  ;;  %v1607_v38 = vld [vmem:[%s3870_s2 + $0x120] sm:$0xff] }
 0x32b   : > { %v1581_v42 = vld [vmem:[%s3870_s2 + $0x50] sm:$0xff] }
 0x32c   : > { %2546 = vpush %v1291_v44  ;;  %v1608_v44 = vld [vmem:[%s3870_s2 + $0x128] sm:$0xff] }
 0x32d   : > { %2548 = vpush %v1302_v34  ;;  %v1582_v34 = vld [vmem:[%s3870_s2 + $0x58] sm:$0xff] }
 0x35d   : > { %s2547_s10 = spop %2546 }
 0x35e   : > { %s2549_s11 = spop %2548 }
 0x35f   : > { %s1304_s12 = ssub.f32 %s2547_s10, %s2549_s11  ;;  %v1311_v56 = vstv %s2549_s11 }
 0x360   : > { %v1312_v8 = vsub.f32 %v1280_v16, %v1311_v56  ;;  %v1585_v56 = vld [vmem:[%s3870_s2 + $0x70] sm:$0xff] }
 0x361   : > { %s1306_s14 = smax.f32 %s2750_s13, %s1304_s12  ;;  %p1305_p6 = scmp.gt.f32.partialorder %s1304_s12, 1e-06 }
 0x362   : > { %v1307_v26 = vstv %s1306_s14 }
 0x363   : > { %2680 = vrcp.f32 %v1307_v26  ;;  %v1609_v26 = vld [vmem:[%s3870_s2 + $0x130] sm:$0xff] }
 0x370   : > { %v2681_v23 = vpop.eup %2680 }
 0x371   : > { %2550 = vpush %v2681_v23  ;;  %v1583_v23 = vld [vmem:[%s3870_s2 + $0x60] sm:$0xff] }
 0x3a2   : > { %s2551_s15 = spop %2550 }
 0x3a3   : > { %s3907_s15 = smov (!%p1305_p6, %s2551_s15), 0.0 }
 0x3a4   : > { %v1313_v54 = vstv %s3907_s15 }
 0x3a5   : > { %v1314_v53 = vmul.f32 %v1313_v54, %v1312_v8  ;;  %v1612_v8 = vld [vmem:[%s3870_s2 + $0x148] sm:$0xff]  ;;  %v1587_v54 = vld [vmem:[%s3870_s2 + $0x80] sm:$0xff] }
 0x3a7   : > { %v1322_v14 = vrot.slane %v1314_v53, %v1321_v50  ;;  %v1614_v53 = vld [vmem:[%s3870_s2 + $0x158] sm:$0xff] }
 0x3a9   : > { %v1323_v6 = vcombine.high %v1322_v14, %v1322_v14  ;;  %v1330_v45 = vrot.slane %v1322_v14, %v1321_v50  ;;  %v1588_v14 = vld [vmem:[%s3870_s2 + $0x88] sm:$0xff] }
 0x3ab   : > { %v1337_v49 = vrot.slane %v1323_v6, %v1321_v50  ;;  %v1341_v55 = vrot.slane %v1330_v45, %v3165_v43  ;;  %v1613_v50 = vld [vmem:[%s3870_s2 + $0x150] sm:$0xff]  ;;  %v1615_v6 = vld [vmem:[%s3870_s2 + $0x160] sm:$0xff] }
 0x3ac   : > { %v1589_v45 = vld [vmem:[%s3870_s2 + $0x90] sm:$0xff] }
 0x3ad   : > { %1355 = vrot.lane.b32.xlu1 %v1341_v55, %s2752_s16  ;;  %1346 = vrot.lane.b32.xlu0 %v1341_v55, %s2753_s17  ;;  %v1345_v19 = vrot.slane %v1337_v49, %v3165_v43  ;;  %v2757_v43 = vmov 0.0   ;;  %v1616_v49 = vld [vmem:[%s3870_s2 + $0x168] sm:$0xff] }
 0x3ae   : > { %1484 = vmatprep.mubr.f32.mxu0 %v2757_v43  ;;  %1564 = vmatprep.mubr.f32.mxu1 %v2757_v43 }
 0x3b1   : > { %1363 = vrot.lane.b32.xlu0 %v1341_v55, %s2754_s18  ;;  %1348 = vrot.lane.b32.xlu1 %v1345_v19, %s2753_s17 }
 0x3b5   : > { %1371 = vrot.lane.b32.xlu0 %v1341_v55, %s2755_s19  ;;  %1357 = vrot.lane.b32.xlu1 %v1345_v19, %s2752_s16 }
 0x3b9   : > { %1379 = vrot.lane.b32.xlu0 %v1341_v55, %s2756_s26  ;;  %1365 = vrot.lane.b32.xlu1 %v1345_v19, %s2754_s18 }
 0x3bd   : > { %1387 = vrot.lane.b32.xlu0 %v1341_v55, %s2758_s7  ;;  %1373 = vrot.lane.b32.xlu1 %v1345_v19, %s2755_s19 }
 0x3c1   : > { %1395 = vrot.lane.b32.xlu0 %v1341_v55, %s2759_s8  ;;  %1381 = vrot.lane.b32.xlu1 %v1345_v19, %s2756_s26  ;;  %v1590_v55 = vld [vmem:[%s3870_s2 + $0x98] sm:$0xff] }
 0x3c5   : > { %1389 = vrot.lane.b32.xlu1 %v1345_v19, %s2758_s7 }
 0x3c9   : > { %1397 = vrot.lane.b32.xlu1 %v1345_v19, %s2759_s8  ;;  %v1617_v19 = vld [vmem:[%s3870_s2 + $0x170] sm:$0xff] }
 0x41f   : > { %v1356_v28 = vpop.permute.xlu1 %1355  ;;  %v1347_v52 = vpop.permute.xlu0 %1346 }
 0x420   : > { %1361 = vst.msk [vmem:[%s3874_s6 + $0x1] sm:$0x1] %vm1352_vm13, %v1356_v28  ;;  %1353 = vst.msk [vmem:[%s3874_s6] sm:$0x1] %vm1352_vm13, %v1347_v52  ;;  %v1593_v28 = vld [vmem:[%s3870_s2 + $0xb0] sm:$0xff]  ;;  %v1620_v52 = vld [vmem:[%s3870_s2 + $0x188] sm:$0xff] }
 0x423   : > { %v1364_v47 = vpop.permute.xlu0 %1363  ;;  %v1349_v2 = vpop.permute.xlu1 %1348 }
 0x424   : > { %1369 = vst.msk [vmem:[%s3874_s6 + $0x2] sm:$0x1] %vm1352_vm13, %v1364_v47  ;;  %1354 = vst.msk [vmem:[%s3874_s6 + $0x8] sm:$0x1] %vm1352_vm13, %v1349_v2  ;;  %v1594_v47 = vld [vmem:[%s3870_s2 + $0xb8] sm:$0xff]  ;;  %v1621_v2 = vld [vmem:[%s3870_s2 + $0x190] sm:$0xff] }
 0x427   : > { %v1372_v36 = vpop.permute.xlu0 %1371  ;;  %v1358_v35 = vpop.permute.xlu1 %1357 }
 0x428   : > { %1377 = vst.msk [vmem:[%s3874_s6 + $0x3] sm:$0x1] %vm1352_vm13, %v1372_v36  ;;  %1362 = vst.msk [vmem:[%s3874_s6 + $0x9] sm:$0x1] %vm1352_vm13, %v1358_v35  ;;  %v1595_v36 = vld [vmem:[%s3870_s2 + $0xc0] sm:$0xff]  ;;  %v1622_v35 = vld [vmem:[%s3870_s2 + $0x198] sm:$0xff] }
 0x42b   : > { %v1380_v21 = vpop.permute.xlu0 %1379  ;;  %v1366_v33 = vpop.permute.xlu1 %1365 }
 0x42c   : > { %1385 = vst.msk [vmem:[%s3874_s6 + $0x4] sm:$0x1] %vm1352_vm13, %v1380_v21  ;;  %1370 = vst.msk [vmem:[%s3874_s6 + $0xa] sm:$0x1] %vm1352_vm13, %v1366_v33  ;;  %v1596_v21 = vld [vmem:[%s3870_s2 + $0xc8] sm:$0xff]  ;;  %v1623_v33 = vld [vmem:[%s3870_s2 + $0x1a0] sm:$0xff] }
 0x42f   : > { %v1388_v37 = vpop.permute.xlu0 %1387  ;;  %v1374_v40 = vpop.permute.xlu1 %1373 }
 0x430   : > { %1393 = vst.msk [vmem:[%s3874_s6 + $0x5] sm:$0x1] %vm1352_vm13, %v1388_v37  ;;  %1378 = vst.msk [vmem:[%s3874_s6 + $0xb] sm:$0x1] %vm1352_vm13, %v1374_v40  ;;  %v1597_v37 = vld [vmem:[%s3870_s2 + $0xd0] sm:$0xff]  ;;  %v1624_v40 = vld [vmem:[%s3870_s2 + $0x1a8] sm:$0xff] }
 0x433   : > { %v1396_v25 = vpop.permute.xlu0 %1395  ;;  %v1382_v1 = vpop.permute.xlu1 %1381 }
 0x434   : > { %1401 = vst.msk [vmem:[%s3874_s6 + $0x6] sm:$0x1] %vm1352_vm13, %v1396_v25  ;;  %1386 = vst.msk [vmem:[%s3874_s6 + $0xc] sm:$0x1] %vm1352_vm13, %v1382_v1  ;;  %v1598_v25 = vld [vmem:[%s3870_s2 + $0xd8] sm:$0xff]  ;;  %v1625_v1 = vld [vmem:[%s3870_s2 + $0x1b0] sm:$0xff] }
 0x437   : > { %v1390_v0 = vpop.permute.xlu1 %1389 }
 0x438   : > { %1394 = vst.msk [vmem:[%s3874_s6 + $0xd] sm:$0x1] %vm1352_vm13, %v1390_v0  ;;  %v1626_v0 = vld [vmem:[%s3870_s2 + $0x1b8] sm:$0xff] }
 0x43b   : > { %v1398_v51 = vpop.permute.xlu1 %1397  ;;  %v1403_v13 = vld [vmem:[%s3874_s6] sm:$0x7f] }
 0x43c   : > { %1402 = vst.msk [vmem:[%s3874_s6 + $0xe] sm:$0x1] %vm1352_vm13, %v1398_v51  ;;  %2475 = vmatmul.mubr.msk.f32.vlgmr.msra.gmra.mxu0 %vm1409_vm14, %v1403_v13 }
 0x43d   : > { %1781 = vmatprep.mubr.f32.mxu0 %v2757_v43 }
 0x443   : > { %v1404_v46 = vld [vmem:[%s3874_s6 + $0x8] sm:$0x7f] }
 0x444   : > { %2478 = vmatmul.mubr.msk.f32.vlgmr.msra.gmra.mxu1 %vm1409_vm14, %v1404_v46 }
 0x445   : > { %2104 = vmatprep.mubr.f32.mxu1 %v2757_v43 }
 0x4fc   : > { %v1486_v7 = vpop.f32.mrf.mxu0 }
 0x4fe   : > { %v1488_v62 = vpop.f32.mrf.mxu0 }
 0x4ff   : > { %2479 = vmatprep.subr.msk.mxu0 %vm1413_vm12, %v1488_v62 }
 0x500   : > { %2480 = vmatpush1.msk.msra.mxu0 %vm1413_vm12, %v1486_v7 }
 0x501   : > { %2481 = vmatmul.mubr.msk.f32.vlgmr.msra.gmra.mxu0 %vm1409_vm14, %v1571_v11 }
 0x502   : > { %1787 = vmatprep.mubr.f32.mxu0 %v2757_v43 }
 0x504   : > { %v1566_v10 = vpop.f32.mrf.mxu1 }
 0x505   : > { %2482 = vmatmul.mubr.msk.f32.gmra.mxu0 %vm1409_vm14, %v1572_v12 }
 0x506   : > { %v1568_v16 = vpop.f32.mrf.mxu1  ;;  %1793 = vmatprep.mubr.f32.mxu0 %v2757_v43 }
 0x507   : > { %2509 = vmatprep.subr.msk.mxu1 %vm1413_vm12, %v1568_v16 }
 0x508   : > { %2510 = vmatpush1.msk.msra.mxu1 %vm1413_vm12, %v1566_v10 }
 0x509   : > { %2511 = vmatmul.mubr.msk.f32.vlgmr.msra.gmra.mxu1 %vm1409_vm14, %v1599_v17  ;;  %2483 = vmatmul.mubr.msk.f32.gmra.mxu0 %vm1409_vm14, %v1573_v31 }
 0x50a   : > { %2110 = vmatprep.mubr.f32.mxu1 %v2757_v43  ;;  %1799 = vmatprep.mubr.f32.mxu0 %v2757_v43 }
 0x50d   : > { %2512 = vmatmul.mubr.msk.f32.gmra.mxu1 %vm1409_vm14, %v1600_v60  ;;  %2484 = vmatmul.mubr.msk.f32.gmra.mxu0 %vm1409_vm14, %v1574_v57 }
 0x50e   : > { %2116 = vmatprep.mubr.f32.mxu1 %v2757_v43  ;;  %1805 = vmatprep.mubr.f32.mxu0 %v2757_v43 }
 0x511   : > { %2513 = vmatmul.mubr.msk.f32.gmra.mxu1 %vm1409_vm14, %v1601_v59  ;;  %2485 = vmatmul.mubr.msk.f32.gmra.mxu0 %vm1409_vm14, %v1575_v61 }
 0x512   : > { %2122 = vmatprep.mubr.f32.mxu1 %v2757_v43  ;;  %1811 = vmatprep.mubr.f32.mxu0 %v2757_v43 }
 0x515   : > { %2514 = vmatmul.mubr.msk.f32.gmra.mxu1 %vm1409_vm14, %v1602_v63  ;;  %2486 = vmatmul.mubr.msk.f32.gmra.mxu0 %vm1409_vm14, %v1576_v3 }
 0x516   : > { %2128 = vmatprep.mubr.f32.mxu1 %v2757_v43  ;;  %1817 = vmatprep.mubr.f32.mxu0 %v2757_v43 }
 0x519   : > { %2515 = vmatmul.mubr.msk.f32.gmra.mxu1 %vm1409_vm14, %v1603_v18  ;;  %2487 = vmatmul.mubr.msk.f32.gmra.mxu0 %vm1409_vm14, %v1577_v5 }
 0x51a   : > { %2134 = vmatprep.mubr.f32.mxu1 %v2757_v43  ;;  %1823 = vmatprep.mubr.f32.mxu0 %v2757_v43 }
 0x51d   : > { %2516 = vmatmul.mubr.msk.f32.gmra.mxu1 %vm1409_vm14, %v1604_v22  ;;  %2488 = vmatmul.mubr.msk.f32.gmra.mxu0 %vm1409_vm14, %v1578_v30 }
 0x51e   : > { %2140 = vmatprep.mubr.f32.mxu1 %v2757_v43  ;;  %1829 = vmatprep.mubr.f32.mxu0 %v2757_v43 }
 0x521   : > { %2517 = vmatmul.mubr.msk.f32.gmra.mxu1 %vm1409_vm14, %v1605_v58  ;;  %2489 = vmatmul.mubr.msk.f32.gmra.mxu0 %vm1409_vm14, %v1579_v20 }
 0x522   : > { %2146 = vmatprep.mubr.f32.mxu1 %v2757_v43  ;;  %1835 = vmatprep.mubr.f32.mxu0 %v2757_v43 }
 0x525   : > { %2518 = vmatmul.mubr.msk.f32.gmra.mxu1 %vm1409_vm14, %v1606_v29  ;;  %2490 = vmatmul.mubr.msk.f32.gmra.mxu0 %vm1409_vm14, %v1580_v32 }
 0x526   : > { %2152 = vmatprep.mubr.f32.mxu1 %v2757_v43  ;;  %1841 = vmatprep.mubr.f32.mxu0 %v2757_v43 }
 0x529   : > { %2519 = vmatmul.mubr.msk.f32.gmra.mxu1 %vm1409_vm14, %v1607_v38  ;;  %2491 = vmatmul.mubr.msk.f32.gmra.mxu0 %vm1409_vm14, %v1581_v42 }
 0x52a   : > { %2158 = vmatprep.mubr.f32.mxu1 %v2757_v43  ;;  %1847 = vmatprep.mubr.f32.mxu0 %v2757_v43 }
 0x52d   : > { %2520 = vmatmul.mubr.msk.f32.gmra.mxu1 %vm1409_vm14, %v1608_v44  ;;  %2492 = vmatmul.mubr.msk.f32.gmra.mxu0 %vm1409_vm14, %v1582_v34 }
 0x52e   : > { %2164 = vmatprep.mubr.f32.mxu1 %v2757_v43  ;;  %1853 = vmatprep.mubr.f32.mxu0 %v2757_v43 }
 0x531   : > { %2521 = vmatmul.mubr.msk.f32.gmra.mxu1 %vm1409_vm14, %v1609_v26  ;;  %2493 = vmatmul.mubr.msk.f32.gmra.mxu0 %vm1409_vm14, %v1583_v23 }
 0x532   : > { %2170 = vmatprep.mubr.f32.mxu1 %v2757_v43  ;;  %1859 = vmatprep.mubr.f32.mxu0 %v2757_v43 }
 0x535   : > { %2522 = vmatmul.mubr.msk.f32.gmra.mxu1 %vm1409_vm14, %v1610_v9  ;;  %2494 = vmatmul.mubr.msk.f32.gmra.mxu0 %vm1409_vm14, %v1584_v39 }
 0x536   : > { %2176 = vmatprep.mubr.f32.mxu1 %v2757_v43  ;;  %1865 = vmatprep.mubr.f32.mxu0 %v2757_v43 }
 0x539   : > { %2523 = vmatmul.mubr.msk.f32.gmra.mxu1 %vm1409_vm14, %v1611_v24  ;;  %2495 = vmatmul.mubr.msk.f32.gmra.mxu0 %vm1409_vm14, %v1585_v56 }
 0x53a   : > { %2182 = vmatprep.mubr.f32.mxu1 %v2757_v43  ;;  %1871 = vmatprep.mubr.f32.mxu0 %v2757_v43 }
 0x53d   : > { %2524 = vmatmul.mubr.msk.f32.gmra.mxu1 %vm1409_vm14, %v1612_v8  ;;  %2496 = vmatmul.mubr.msk.f32.gmra.mxu0 %vm1409_vm14, %v1586_v4 }
 0x53e   : > { %2188 = vmatprep.mubr.f32.mxu1 %v2757_v43  ;;  %1877 = vmatprep.mubr.f32.mxu0 %v2757_v43 }
 0x541   : > { %2525 = vmatmul.mubr.msk.f32.gmra.mxu1 %vm1409_vm14, %v1613_v50  ;;  %2497 = vmatmul.mubr.msk.f32.gmra.mxu0 %vm1409_vm14, %v1587_v54 }
 0x542   : > { %2194 = vmatprep.mubr.f32.mxu1 %v2757_v43  ;;  %1883 = vmatprep.mubr.f32.mxu0 %v2757_v43 }
 0x545   : > { %2526 = vmatmul.mubr.msk.f32.gmra.mxu1 %vm1409_vm14, %v1614_v53  ;;  %2498 = vmatmul.mubr.msk.f32.gmra.mxu0 %vm1409_vm14, %v1588_v14 }
 0x546   : > { %2200 = vmatprep.mubr.f32.mxu1 %v2757_v43  ;;  %1889 = vmatprep.mubr.f32.mxu0 %v2757_v43 }
 0x549   : > { %2527 = vmatmul.mubr.msk.f32.gmra.mxu1 %vm1409_vm14, %v1615_v6  ;;  %2499 = vmatmul.mubr.msk.f32.gmra.mxu0 %vm1409_vm14, %v1589_v45 }
 0x54a   : > { %2206 = vmatprep.mubr.f32.mxu1 %v2757_v43  ;;  %1895 = vmatprep.mubr.f32.mxu0 %v2757_v43 }
 0x54d   : > { %2528 = vmatmul.mubr.msk.f32.gmra.mxu1 %vm1409_vm14, %v1616_v49  ;;  %2500 = vmatmul.mubr.msk.f32.gmra.mxu0 %vm1409_vm14, %v1590_v55 }
 0x54e   : > { %2212 = vmatprep.mubr.f32.mxu1 %v2757_v43  ;;  %1901 = vmatprep.mubr.f32.mxu0 %v2757_v43 }
 0x551   : > { %2529 = vmatmul.mubr.msk.f32.gmra.mxu1 %vm1409_vm14, %v1617_v19  ;;  %2501 = vmatmul.mubr.msk.f32.gmra.mxu0 %vm1409_vm14, %v1591_v48 }
 0x552   : > { %2218 = vmatprep.mubr.f32.mxu1 %v2757_v43  ;;  %1907 = vmatprep.mubr.f32.mxu0 %v2757_v43 }
 0x555   : > { %2530 = vmatmul.mubr.msk.f32.gmra.mxu1 %vm1409_vm14, %v1618_v41  ;;  %2502 = vmatmul.mubr.msk.f32.gmra.mxu0 %vm1409_vm14, %v1592_v15 }
 0x556   : > { %2224 = vmatprep.mubr.f32.mxu1 %v2757_v43  ;;  %1913 = vmatprep.mubr.f32.mxu0 %v2757_v43 }
 0x559   : > { %2531 = vmatmul.mubr.msk.f32.gmra.mxu1 %vm1409_vm14, %v1619_v27  ;;  %2503 = vmatmul.mubr.msk.f32.gmra.mxu0 %vm1409_vm14, %v1593_v28 }
 0x55a   : > { %2230 = vmatprep.mubr.f32.mxu1 %v2757_v43  ;;  %1919 = vmatprep.mubr.f32.mxu0 %v2757_v43 }
 0x55d   : > { %2532 = vmatmul.mubr.msk.f32.gmra.mxu1 %vm1409_vm14, %v1620_v52  ;;  %2504 = vmatmul.mubr.msk.f32.gmra.mxu0 %vm1409_vm14, %v1594_v47 }
 0x55e   : > { %2236 = vmatprep.mubr.f32.mxu1 %v2757_v43  ;;  %1925 = vmatprep.mubr.f32.mxu0 %v2757_v43 }
 0x561   : > { %2533 = vmatmul.mubr.msk.f32.gmra.mxu1 %vm1409_vm14, %v1621_v2  ;;  %2505 = vmatmul.mubr.msk.f32.gmra.mxu0 %vm1409_vm14, %v1595_v36 }
 0x562   : > { %2242 = vmatprep.mubr.f32.mxu1 %v2757_v43  ;;  %1931 = vmatprep.mubr.f32.mxu0 %v2757_v43 }
 0x565   : > { %2534 = vmatmul.mubr.msk.f32.gmra.mxu1 %vm1409_vm14, %v1622_v35  ;;  %2506 = vmatmul.mubr.msk.f32.gmra.mxu0 %vm1409_vm14, %v1596_v21 }
 0x566   : > { %2248 = vmatprep.mubr.f32.mxu1 %v2757_v43  ;;  %1937 = vmatprep.mubr.f32.mxu0 %v2757_v43 }
 0x569   : > { %2535 = vmatmul.mubr.msk.f32.gmra.mxu1 %vm1409_vm14, %v1623_v33  ;;  %2507 = vmatmul.mubr.msk.f32.gmra.mxu0 %vm1409_vm14, %v1597_v37 }
 0x56a   : > { %2254 = vmatprep.mubr.f32.mxu1 %v2757_v43  ;;  %1943 = vmatprep.mubr.f32.mxu0 %v2757_v43 }
 0x56d   : > { %2536 = vmatmul.mubr.msk.f32.gmra.mxu1 %vm1409_vm14, %v1624_v40  ;;  %2508 = vmatmul.mubr.msk.f32.gmra.mxu0 %vm1409_vm14, %v1598_v25 }
 0x56e   : > { %2260 = vmatprep.mubr.f32.mxu1 %v2757_v43 }
 0x571   : > { %2537 = vmatmul.mubr.msk.f32.gmra.mxu1 %vm1409_vm14, %v1625_v1 }
 0x572   : > { %2266 = vmatprep.mubr.f32.mxu1 %v2757_v43 }
 0x575   : > { %2538 = vmatmul.mubr.msk.f32.gmra.mxu1 %vm1409_vm14, %v1626_v0 }
 0x5c1   : > { %v1783_v51 = vpop.f32.mrf.mxu0 }
 0x5c2   : > { %2273 = vst [vmem:[#allocation6] sm:$0xff] %v1783_v51 }
 0x5c3   : > { %v1785_v13 = vpop.f32.mrf.mxu0 }
 0x5c4   : > { %2275 = vst.msk [vmem:[#allocation6 + $0x8] sm:$0xff] %vm2274_vm15, %v1785_v13 }
 0x5c5   : > { %v1789_v46 = vpop.f32.mrf.mxu0 }
 0x5c6   : > { %2276 = vst [vmem:[#allocation6 + $0x10] sm:$0xff] %v1789_v46 }
 0x5c7   : > { %v1791_v7 = vpop.f32.mrf.mxu0 }
 0x5c8   : > { %2277 = vst.msk [vmem:[#allocation6 + $0x18] sm:$0xff] %vm2274_vm15, %v1791_v7 }
 0x5c9   : > { %v2106_v62 = vpop.f32.mrf.mxu1  ;;  %v1795_v11 = vpop.f32.mrf.mxu0 }
 0x5ca   : > { %2330 = vst [vmem:[#allocation6 + $0x1c0] sm:$0xff] %v2106_v62  ;;  %2278 = vst [vmem:[#allocation6 + $0x20] sm:$0xff] %v1795_v11 }
 0x5cb   : > { %v2108_v43 = vpop.f32.mrf.mxu1  ;;  %v1797_v12 = vpop.f32.mrf.mxu0 }
 0x5cc   : > { %2331 = vst.msk [vmem:[#allocation6 + $0x1c8] sm:$0xff] %vm2274_vm15, %v2108_v43  ;;  %2279 = vst.msk [vmem:[#allocation6 + $0x28] sm:$0xff] %vm2274_vm15, %v1797_v12 }
 0x5cd   : > { %v2112_v10 = vpop.f32.mrf.mxu1  ;;  %v1801_v16 = vpop.f32.mrf.mxu0 }
 0x5ce   : > { %2332 = vst [vmem:[#allocation6 + $0x1d0] sm:$0xff] %v2112_v10  ;;  %2280 = vst [vmem:[#allocation6 + $0x30] sm:$0xff] %v1801_v16 }
 0x5cf   : > { %v2114_v17 = vpop.f32.mrf.mxu1  ;;  %v1803_v31 = vpop.f32.mrf.mxu0 }
 0x5d0   : > { %2333 = vst.msk [vmem:[#allocation6 + $0x1d8] sm:$0xff] %vm2274_vm15, %v2114_v17  ;;  %2281 = vst.msk [vmem:[#allocation6 + $0x38] sm:$0xff] %vm2274_vm15, %v1803_v31 }
 0x5d1   : > { %v2118_v60 = vpop.f32.mrf.mxu1  ;;  %v1807_v57 = vpop.f32.mrf.mxu0 }
 0x5d2   : > { %2334 = vst [vmem:[#allocation6 + $0x1e0] sm:$0xff] %v2118_v60  ;;  %2282 = vst [vmem:[#allocation6 + $0x40] sm:$0xff] %v1807_v57 }
 0x5d3   : > { %v2120_v59 = vpop.f32.mrf.mxu1  ;;  %v1809_v61 = vpop.f32.mrf.mxu0 }
 0x5d4   : > { %2335 = vst.msk [vmem:[#allocation6 + $0x1e8] sm:$0xff] %vm2274_vm15, %v2120_v59  ;;  %2283 = vst.msk [vmem:[#allocation6 + $0x48] sm:$0xff] %vm2274_vm15, %v1809_v61 }
 0x5d5   : > { %v2124_v63 = vpop.f32.mrf.mxu1  ;;  %v1813_v3 = vpop.f32.mrf.mxu0 }
 0x5d6   : > { %2336 = vst [vmem:[#allocation6 + $0x1f0] sm:$0xff] %v2124_v63  ;;  %2284 = vst [vmem:[#allocation6 + $0x50] sm:$0xff] %v1813_v3 }
 0x5d7   : > { %v2126_v18 = vpop.f32.mrf.mxu1  ;;  %v1815_v5 = vpop.f32.mrf.mxu0 }
 0x5d8   : > { %2337 = vst.msk [vmem:[#allocation6 + $0x1f8] sm:$0xff] %vm2274_vm15, %v2126_v18  ;;  %2285 = vst.msk [vmem:[#allocation6 + $0x58] sm:$0xff] %vm2274_vm15, %v1815_v5 }
 0x5d9   : > { %v2130_v22 = vpop.f32.mrf.mxu1  ;;  %v1819_v30 = vpop.f32.mrf.mxu0 }
 0x5da   : > { %2338 = vst [vmem:[#allocation6 + $0x200] sm:$0xff] %v2130_v22  ;;  %2286 = vst [vmem:[#allocation6 + $0x60] sm:$0xff] %v1819_v30 }
 0x5db   : > { %v2132_v58 = vpop.f32.mrf.mxu1  ;;  %v1821_v20 = vpop.f32.mrf.mxu0 }
 0x5dc   : > { %2339 = vst.msk [vmem:[#allocation6 + $0x208] sm:$0xff] %vm2274_vm15, %v2132_v58  ;;  %2287 = vst.msk [vmem:[#allocation6 + $0x68] sm:$0xff] %vm2274_vm15, %v1821_v20 }
 0x5dd   : > { %v2136_v29 = vpop.f32.mrf.mxu1  ;;  %v1825_v32 = vpop.f32.mrf.mxu0 }
 0x5de   : > { %2340 = vst [vmem:[#allocation6 + $0x210] sm:$0xff] %v2136_v29  ;;  %2288 = vst [vmem:[#allocation6 + $0x70] sm:$0xff] %v1825_v32 }
 0x5df   : > { %v2138_v38 = vpop.f32.mrf.mxu1  ;;  %v1827_v42 = vpop.f32.mrf.mxu0 }
 0x5e0   : > { %2341 = vst.msk [vmem:[#allocation6 + $0x218] sm:$0xff] %vm2274_vm15, %v2138_v38  ;;  %2289 = vst.msk [vmem:[#allocation6 + $0x78] sm:$0xff] %vm2274_vm15, %v1827_v42 }
 0x5e1   : > { %v2142_v44 = vpop.f32.mrf.mxu1  ;;  %v1831_v34 = vpop.f32.mrf.mxu0 }
 0x5e2   : > { %2342 = vst [vmem:[#allocation6 + $0x220] sm:$0xff] %v2142_v44  ;;  %2290 = vst [vmem:[#allocation6 + $0x80] sm:$0xff] %v1831_v34 }
 0x5e3   : > { %v2144_v26 = vpop.f32.mrf.mxu1  ;;  %v1833_v23 = vpop.f32.mrf.mxu0 }
 0x5e4   : > { %2343 = vst.msk [vmem:[#allocation6 + $0x228] sm:$0xff] %vm2274_vm15, %v2144_v26  ;;  %2291 = vst.msk [vmem:[#allocation6 + $0x88] sm:$0xff] %vm2274_vm15, %v1833_v23 }
 0x5e5   : > { %v2148_v9 = vpop.f32.mrf.mxu1  ;;  %v1837_v39 = vpop.f32.mrf.mxu0 }
 0x5e6   : > { %2344 = vst [vmem:[#allocation6 + $0x230] sm:$0xff] %v2148_v9  ;;  %2292 = vst [vmem:[#allocation6 + $0x90] sm:$0xff] %v1837_v39 }
 0x5e7   : > { %v2150_v24 = vpop.f32.mrf.mxu1  ;;  %v1839_v56 = vpop.f32.mrf.mxu0 }
 0x5e8   : > { %2345 = vst.msk [vmem:[#allocation6 + $0x238] sm:$0xff] %vm2274_vm15, %v2150_v24  ;;  %2293 = vst.msk [vmem:[#allocation6 + $0x98] sm:$0xff] %vm2274_vm15, %v1839_v56 }
 0x5e9   : > { %v2154_v8 = vpop.f32.mrf.mxu1  ;;  %v1843_v4 = vpop.f32.mrf.mxu0 }
 0x5ea   : > { %2346 = vst [vmem:[#allocation6 + $0x240] sm:$0xff] %v2154_v8  ;;  %2294 = vst [vmem:[#allocation6 + $0xa0] sm:$0xff] %v1843_v4 }
 0x5eb   : > { %v2156_v50 = vpop.f32.mrf.mxu1  ;;  %v1845_v54 = vpop.f32.mrf.mxu0 }
 0x5ec   : > { %2347 = vst.msk [vmem:[#allocation6 + $0x248] sm:$0xff] %vm2274_vm15, %v2156_v50  ;;  %2295 = vst.msk [vmem:[#allocation6 + $0xa8] sm:$0xff] %vm2274_vm15, %v1845_v54 }
 0x5ed   : > { %v2160_v53 = vpop.f32.mrf.mxu1  ;;  %v1849_v14 = vpop.f32.mrf.mxu0 }
 0x5ee   : > { %2348 = vst [vmem:[#allocation6 + $0x250] sm:$0xff] %v2160_v53  ;;  %2296 = vst [vmem:[#allocation6 + $0xb0] sm:$0xff] %v1849_v14 }
 0x5ef   : > { %v2162_v6 = vpop.f32.mrf.mxu1  ;;  %v1851_v45 = vpop.f32.mrf.mxu0 }
 0x5f0   : > { %2349 = vst.msk [vmem:[#allocation6 + $0x258] sm:$0xff] %vm2274_vm15, %v2162_v6  ;;  %2297 = vst.msk [vmem:[#allocation6 + $0xb8] sm:$0xff] %vm2274_vm15, %v1851_v45 }
 0x5f1   : > { %v2166_v49 = vpop.f32.mrf.mxu1  ;;  %v1855_v55 = vpop.f32.mrf.mxu0 }
 0x5f2   : > { %2350 = vst [vmem:[#allocation6 + $0x260] sm:$0xff] %v2166_v49  ;;  %2298 = vst [vmem:[#allocation6 + $0xc0] sm:$0xff] %v1855_v55 }
 0x5f3   : > { %v2168_v19 = vpop.f32.mrf.mxu1  ;;  %v1857_v48 = vpop.f32.mrf.mxu0 }
 0x5f4   : > { %2351 = vst.msk [vmem:[#allocation6 + $0x268] sm:$0xff] %vm2274_vm15, %v2168_v19  ;;  %2299 = vst.msk [vmem:[#allocation6 + $0xc8] sm:$0xff] %vm2274_vm15, %v1857_v48 }
 0x5f5   : > { %v2172_v41 = vpop.f32.mrf.mxu1  ;;  %v1861_v15 = vpop.f32.mrf.mxu0 }
 0x5f6   : > { %2352 = vst [vmem:[#allocation6 + $0x270] sm:$0xff] %v2172_v41  ;;  %2300 = vst [vmem:[#allocation6 + $0xd0] sm:$0xff] %v1861_v15 }
 0x5f7   : > { %v2174_v27 = vpop.f32.mrf.mxu1  ;;  %v1863_v28 = vpop.f32.mrf.mxu0 }
 0x5f8   : > { %2353 = vst.msk [vmem:[#allocation6 + $0x278] sm:$0xff] %vm2274_vm15, %v2174_v27  ;;  %2301 = vst.msk [vmem:[#allocation6 + $0xd8] sm:$0xff] %vm2274_vm15, %v1863_v28 }
 0x5f9   : > { %v2178_v52 = vpop.f32.mrf.mxu1  ;;  %v1867_v47 = vpop.f32.mrf.mxu0 }
 0x5fa   : > { %2354 = vst [vmem:[#allocation6 + $0x280] sm:$0xff] %v2178_v52  ;;  %2302 = vst [vmem:[#allocation6 + $0xe0] sm:$0xff] %v1867_v47 }
 0x5fb   : > { %v2180_v2 = vpop.f32.mrf.mxu1  ;;  %v1869_v36 = vpop.f32.mrf.mxu0 }
 0x5fc   : > { %2355 = vst.msk [vmem:[#allocation6 + $0x288] sm:$0xff] %vm2274_vm15, %v2180_v2  ;;  %2303 = vst.msk [vmem:[#allocation6 + $0xe8] sm:$0xff] %vm2274_vm15, %v1869_v36 }
 0x5fd   : > { %v2184_v35 = vpop.f32.mrf.mxu1  ;;  %v1873_v21 = vpop.f32.mrf.mxu0 }
 0x5fe   : > { %2356 = vst [vmem:[#allocation6 + $0x290] sm:$0xff] %v2184_v35  ;;  %2304 = vst [vmem:[#allocation6 + $0xf0] sm:$0xff] %v1873_v21 }
 0x5ff   : > { %v2186_v33 = vpop.f32.mrf.mxu1  ;;  %v1875_v37 = vpop.f32.mrf.mxu0 }
 0x600   : > { %2357 = vst.msk [vmem:[#allocation6 + $0x298] sm:$0xff] %vm2274_vm15, %v2186_v33  ;;  %2305 = vst.msk [vmem:[#allocation6 + $0xf8] sm:$0xff] %vm2274_vm15, %v1875_v37 }
 0x601   : > { %v2190_v40 = vpop.f32.mrf.mxu1  ;;  %v1879_v25 = vpop.f32.mrf.mxu0 }
 0x602   : > { %2358 = vst [vmem:[#allocation6 + $0x2a0] sm:$0xff] %v2190_v40  ;;  %2306 = vst [vmem:[#allocation6 + $0x100] sm:$0xff] %v1879_v25 }
 0x603   : > { %v2192_v1 = vpop.f32.mrf.mxu1  ;;  %v1881_v0 = vpop.f32.mrf.mxu0 }
 0x604   : > { %2359 = vst.msk [vmem:[#allocation6 + $0x2a8] sm:$0xff] %vm2274_vm15, %v2192_v1  ;;  %2307 = vst.msk [vmem:[#allocation6 + $0x108] sm:$0xff] %vm2274_vm15, %v1881_v0 }
 0x605   : > { %v2196_v51 = vpop.f32.mrf.mxu1  ;;  %v1885_v13 = vpop.f32.mrf.mxu0 }
 0x606   : > { %2360 = vst [vmem:[#allocation6 + $0x2b0] sm:$0xff] %v2196_v51  ;;  %2308 = vst [vmem:[#allocation6 + $0x110] sm:$0xff] %v1885_v13 }
 0x607   : > { %v2198_v46 = vpop.f32.mrf.mxu1  ;;  %v1887_v7 = vpop.f32.mrf.mxu0 }
 0x608   : > { %2361 = vst.msk [vmem:[#allocation6 + $0x2b8] sm:$0xff] %vm2274_vm15, %v2198_v46  ;;  %2309 = vst.msk [vmem:[#allocation6 + $0x118] sm:$0xff] %vm2274_vm15, %v1887_v7 }
 0x609   : > { %v2202_v62 = vpop.f32.mrf.mxu1  ;;  %v1891_v11 = vpop.f32.mrf.mxu0 }
 0x60a   : > { %2362 = vst [vmem:[#allocation6 + $0x2c0] sm:$0xff] %v2202_v62  ;;  %2310 = vst [vmem:[#allocation6 + $0x120] sm:$0xff] %v1891_v11 }
 0x60b   : > { %v2204_v43 = vpop.f32.mrf.mxu1  ;;  %v1893_v12 = vpop.f32.mrf.mxu0 }
 0x60c   : > { %2363 = vst.msk [vmem:[#allocation6 + $0x2c8] sm:$0xff] %vm2274_vm15, %v2204_v43  ;;  %2311 = vst.msk [vmem:[#allocation6 + $0x128] sm:$0xff] %vm2274_vm15, %v1893_v12 }
 0x60d   : > { %v2208_v10 = vpop.f32.mrf.mxu1  ;;  %v1897_v16 = vpop.f32.mrf.mxu0 }
 0x60e   : > { %2364 = vst [vmem:[#allocation6 + $0x2d0] sm:$0xff] %v2208_v10  ;;  %2312 = vst [vmem:[#allocation6 + $0x130] sm:$0xff] %v1897_v16 }
 0x60f   : > { %v2210_v17 = vpop.f32.mrf.mxu1  ;;  %v1899_v31 = vpop.f32.mrf.mxu0 }
 0x610   : > { %2365 = vst.msk [vmem:[#allocation6 + $0x2d8] sm:$0xff] %vm2274_vm15, %v2210_v17  ;;  %2313 = vst.msk [vmem:[#allocation6 + $0x138] sm:$0xff] %vm2274_vm15, %v1899_v31 }
 0x611   : > { %v2214_v60 = vpop.f32.mrf.mxu1  ;;  %v1903_v57 = vpop.f32.mrf.mxu0 }
 0x612   : > { %2366 = vst [vmem:[#allocation6 + $0x2e0] sm:$0xff] %v2214_v60  ;;  %2314 = vst [vmem:[#allocation6 + $0x140] sm:$0xff] %v1903_v57 }
 0x613   : > { %v2216_v59 = vpop.f32.mrf.mxu1  ;;  %v1905_v61 = vpop.f32.mrf.mxu0 }
 0x614   : > { %2367 = vst.msk [vmem:[#allocation6 + $0x2e8] sm:$0xff] %vm2274_vm15, %v2216_v59  ;;  %2315 = vst.msk [vmem:[#allocation6 + $0x148] sm:$0xff] %vm2274_vm15, %v1905_v61 }
 0x615   : > { %v2220_v63 = vpop.f32.mrf.mxu1  ;;  %v1909_v3 = vpop.f32.mrf.mxu0 }
 0x616   : > { %2368 = vst [vmem:[#allocation6 + $0x2f0] sm:$0xff] %v2220_v63  ;;  %2316 = vst [vmem:[#allocation6 + $0x150] sm:$0xff] %v1909_v3 }
 0x617   : > { %v2222_v18 = vpop.f32.mrf.mxu1  ;;  %v1911_v5 = vpop.f32.mrf.mxu0 }
 0x618   : > { %2369 = vst.msk [vmem:[#allocation6 + $0x2f8] sm:$0xff] %vm2274_vm15, %v2222_v18  ;;  %2317 = vst.msk [vmem:[#allocation6 + $0x158] sm:$0xff] %vm2274_vm15, %v1911_v5 }
 0x619   : > { %v2226_v22 = vpop.f32.mrf.mxu1  ;;  %v1915_v30 = vpop.f32.mrf.mxu0 }
 0x61a   : > { %2370 = vst [vmem:[#allocation6 + $0x300] sm:$0xff] %v2226_v22  ;;  %2318 = vst [vmem:[#allocation6 + $0x160] sm:$0xff] %v1915_v30 }
 0x61b   : > { %v2228_v58 = vpop.f32.mrf.mxu1  ;;  %v1917_v20 = vpop.f32.mrf.mxu0 }
 0x61c   : > { %2371 = vst.msk [vmem:[#allocation6 + $0x308] sm:$0xff] %vm2274_vm15, %v2228_v58  ;;  %2319 = vst.msk [vmem:[#allocation6 + $0x168] sm:$0xff] %vm2274_vm15, %v1917_v20 }
 0x61d   : > { %v2232_v29 = vpop.f32.mrf.mxu1  ;;  %v1921_v32 = vpop.f32.mrf.mxu0 }
 0x61e   : > { %2372 = vst [vmem:[#allocation6 + $0x310] sm:$0xff] %v2232_v29  ;;  %2320 = vst [vmem:[#allocation6 + $0x170] sm:$0xff] %v1921_v32 }
 0x61f   : > { %v2234_v38 = vpop.f32.mrf.mxu1  ;;  %v1923_v42 = vpop.f32.mrf.mxu0 }
 0x620   : > { %2373 = vst.msk [vmem:[#allocation6 + $0x318] sm:$0xff] %vm2274_vm15, %v2234_v38  ;;  %2321 = vst.msk [vmem:[#allocation6 + $0x178] sm:$0xff] %vm2274_vm15, %v1923_v42 }
 0x621   : > { %v2238_v44 = vpop.f32.mrf.mxu1  ;;  %v1927_v34 = vpop.f32.mrf.mxu0 }
 0x622   : > { %2374 = vst [vmem:[#allocation6 + $0x320] sm:$0xff] %v2238_v44  ;;  %2322 = vst [vmem:[#allocation6 + $0x180] sm:$0xff] %v1927_v34 }
 0x623   : > { %v2240_v26 = vpop.f32.mrf.mxu1  ;;  %v1929_v23 = vpop.f32.mrf.mxu0 }
 0x624   : > { %2375 = vst.msk [vmem:[#allocation6 + $0x328] sm:$0xff] %vm2274_vm15, %v2240_v26  ;;  %2323 = vst.msk [vmem:[#allocation6 + $0x188] sm:$0xff] %vm2274_vm15, %v1929_v23 }
 0x625   : > { %v2244_v9 = vpop.f32.mrf.mxu1  ;;  %v1933_v39 = vpop.f32.mrf.mxu0 }
 0x626   : > { %2376 = vst [vmem:[#allocation6 + $0x330] sm:$0xff] %v2244_v9  ;;  %2324 = vst [vmem:[#allocation6 + $0x190] sm:$0xff] %v1933_v39 }
 0x627   : > { %v2246_v24 = vpop.f32.mrf.mxu1  ;;  %v1935_v56 = vpop.f32.mrf.mxu0 }
 0x628   : > { %2377 = vst.msk [vmem:[#allocation6 + $0x338] sm:$0xff] %vm2274_vm15, %v2246_v24  ;;  %2325 = vst.msk [vmem:[#allocation6 + $0x198] sm:$0xff] %vm2274_vm15, %v1935_v56 }
 0x629   : > { %v2250_v8 = vpop.f32.mrf.mxu1  ;;  %v1939_v4 = vpop.f32.mrf.mxu0 }
 0x62a   : > { %2378 = vst [vmem:[#allocation6 + $0x340] sm:$0xff] %v2250_v8  ;;  %2326 = vst [vmem:[#allocation6 + $0x1a0] sm:$0xff] %v1939_v4 }
 0x62b   : > { %v2252_v50 = vpop.f32.mrf.mxu1  ;;  %v1941_v54 = vpop.f32.mrf.mxu0 }
 0x62c   : > { %2379 = vst.msk [vmem:[#allocation6 + $0x348] sm:$0xff] %vm2274_vm15, %v2252_v50  ;;  %2327 = vst.msk [vmem:[#allocation6 + $0x1a8] sm:$0xff] %vm2274_vm15, %v1941_v54 }
 0x62d   : > { %v2256_v53 = vpop.f32.mrf.mxu1  ;;  %v1945_v14 = vpop.f32.mrf.mxu0 }
 0x62e   : > { %2380 = vst [vmem:[#allocation6 + $0x350] sm:$0xff] %v2256_v53  ;;  %2328 = vst [vmem:[#allocation6 + $0x1b0] sm:$0xff] %v1945_v14 }
 0x62f   : > { %v2258_v6 = vpop.f32.mrf.mxu1  ;;  %v1947_v45 = vpop.f32.mrf.mxu0 }
 0x630   : > { %2381 = vst.msk [vmem:[#allocation6 + $0x358] sm:$0xff] %vm2274_vm15, %v2258_v6  ;;  %2329 = vst.msk [vmem:[#allocation6 + $0x1b8] sm:$0xff] %vm2274_vm15, %v1947_v45 }
 0x631   : > { %v2262_v49 = vpop.f32.mrf.mxu1 }
 0x632   : > { %2382 = vst [vmem:[#allocation6 + $0x360] sm:$0xff] %v2262_v49 }
 0x633   : > { %v2264_v55 = vpop.f32.mrf.mxu1 }
 0x634   : > { %2383 = vst.msk [vmem:[#allocation6 + $0x368] sm:$0xff] %vm2274_vm15, %v2264_v55 }
 0x635   : > { %v2268_v19 = vpop.f32.mrf.mxu1 }
 0x636   : > { %2384 = vst [vmem:[#allocation6 + $0x370] sm:$0xff] %v2268_v19 }
 0x637   : > { %v2270_v48 = vpop.f32.mrf.mxu1 }
 0x638   : > { %2385 = vst.msk [vmem:[#allocation6 + $0x378] sm:$0xff] %vm2274_vm15, %v2270_v48 }
 0x639 PF: > { %p2560_p7 = scmp.eq.s32.totalorder %s2805_s22, 11  ;;  %s2760_s23 = smov [#allocation4]  }
 0x63a   : > { %s2393_s24 = sshll.u32 %s2760_s23, 4  ;;  %s2761_s25 = smov [#allocation6]   ;;  %s2394_s24 = int_to_ptr.vmem [resolvable:$true] %s2393_s24 }
 0x63b   : > { %s2403_s26 = sshll.u32 %s2761_s25, 4  ;;  %s2682_s27 = scalar_lea.vmem %s2394_s24, 32  ;;  %s2404_s26 = int_to_ptr.vmem [resolvable:$true] %s2403_s26 }
 0x63c   : > { %p2683_p8 = scmp.ne.s32.totalorder %s2394_s24, %s2682_s27  ;;  %p2689_p11 = scmp.lt.s32.totalorder %s2394_s24, %s2394_s24 }
 0x63d   : > { %p2690_p12 = scmp.lt.s32.totalorder %s2682_s27, %s2682_s27 }
 0x63e   : > { %p2684_p9 = pnand %p2683_p8, %p2560_p7 }
 0x63f   : > { %p2691_p13 = por %p2690_p12, %p2689_p11 }
 0x640   : > { %p2685_p10 = pneg %p2684_p9 }
 0x642   : > { %p2692_p0 = pnand %p2691_p13, %p2685_p10 }
 0x644   : > { %2695 = shalt.err (!%p2692_p0)
}
 0x645   : > { %2553 = dma.vmem_to_hbm [thread:$0]  (%p2560_p7), %s2394_s24, 32, %s3872_s4, [#allocation5]  }
 0x646   : > { %s2706_s30 = scalar_lea.vmem %s2404_s26, 14336  ;;  %p2713_p4 = scmp.lt.s32.totalorder %s2404_s26, %s2404_s26 }
 0x647   : > { %p2707_p1 = scmp.ne.s32.totalorder %s2404_s26, %s2706_s30  ;;  %p2714_p5 = scmp.lt.s32.totalorder %s2706_s30, %s2706_s30 }
 0x649   : > { %p2708_p2 = pnand %p2707_p1, %p2560_p7  ;;  %p2715_p6 = por %p2714_p5, %p2713_p4 }
 0x64b   : > { %p2709_p3 = pneg %p2708_p2 }
 0x64d   : > { %p2716_p8 = pnand %p2715_p6, %p2709_p3 }
 0x64f   : > { %2719 = shalt.err (!%p2716_p8)
}
 0x650   : > { %s2762_s7 = smov 256   ;;  %s2763_s8 = smov 16  }
 0x651   : > { %2555 = dma.vmem_to_hbm [thread:$0]  (%p2560_p7), %s2404_s26, 14336, %s3873_s5, [#allocation7], %s2762_s7, %s2762_s7, %s2763_s8  }
 0x652   : > { %2735 = dma.done.wait (%p2560_p7), [#allocation5], 32  }
 0x653   : > { %2737 = vsyncadd (%p2560_p7), [#allocation5], 4294967264 }
 0x654   : > { %2739 = dma.done.wait (%p2560_p7), [#allocation7], 14336  }
 0x655   : > { %2741 = vsyncadd (%p2560_p7), [#allocation7], 4294952960 }
 0x656 PF: > { %s19_s21 = sadd.s32 1, %s2744_s21  }
 0x657   : > { %p16_p9 = scmp.ge.s32.totalorder %s19_s21, 14  }
 0x659   :  { %18 = sbr.rel (!%p16_p9) target bundleno = 2 (0x2), region = 88 }
 0x65e   :  { %2429 = vsyncpa [#allocation5], 1 }
 0x65f   :  { %2431 = vsyncpa [#allocation5 + $0x1], 1 }
 0x660   :  { %2432 = vsyncpa [#allocation7], 1 }

</bundles_post_ra>
